<compile_context>
chip_gen: v5e
topology: v5e:2x2
jax: 0.10.0
libtpu: 0.0.40
codegen_flags: <defaults>
</compile_context>

<pallas_src>
import functools
import math

import jax
import jax.numpy as jnp
from jax import lax
from jax.experimental import pallas as pl
from jax.experimental.pallas import tpu as pltpu

LANE = 128  # TPU lane width; output feature dim is padded to a multiple of this.


def _mlp_gate_kernel(z_ref, h_ref, w1_ref, w2_ref, b_ref, o_ref, *, valid_out):
    # z_ref: [TB, D1]   h_ref: [TB, D2]
    # w1_ref: [D1, Opad] w2_ref: [D2, Opad] (resident), b_ref: [1, Opad] (f32, resident)
    # o_ref: [TB, Opad]  (lane-dense padded output block)
    y = jnp.dot(z_ref[...], w1_ref[...], preferred_element_type=jnp.float32)
    y = y + jnp.dot(h_ref[...], w2_ref[...], preferred_element_type=jnp.float32)
    y = y + b_ref[...].astype(jnp.float32)

    # LeakyReLU (default negative_slope = 0.01)
    y = jnp.where(y >= 0, y, 0.01 * y)

    # Mask padded output columns so they do not contribute to the softmax.
    col = lax.broadcasted_iota(jnp.int32, y.shape, 1)
    y = jnp.where(col < valid_out, y, -jnp.inf)

    # Numerically stable softmax along the feature dim (whole row is in-block).
    m = jnp.max(y, axis=-1, keepdims=True)
    e = jnp.exp(y - m)
    denom = jnp.sum(e, axis=-1, keepdims=True)
    o_ref[...] = (e * pl.reciprocal(denom, approx=True)).astype(o_ref.dtype)


def prepare_mlp_params(weight, bias, d1, *, operand_dtype=None):
    """One-time (init) parameter prep.

    weight: [O, D1+D2] (PyTorch nn.Linear layout), bias: [O].
    Returns W1=[D1, Opad], W2=[D2, Opad] (transposed + lane-padded),
    bias_pad=[1, Opad] (kept f32), and O (the true output dim).
    """
    O, D = weight.shape
    opad = max(LANE, ((O + LANE - 1) // LANE) * LANE)
    w_t = weight.T  # [D, O] — done once at init, not per forward call
    w1 = jnp.pad(w_t[:d1], ((0, 0), (0, opad - O)))
    w2 = jnp.pad(w_t[d1:], ((0, 0), (0, opad - O)))
    b = jnp.pad(bias.reshape(1, -1).astype(jnp.float32), ((0, 0), (0, opad - O)))
    if operand_dtype is not None:
        w1 = w1.astype(operand_dtype)
        w2 = w2.astype(operand_dtype)
    return w1, w2, b, O


def _pick_batch_tile(batch, requested):
    for tb in (requested, 256, 128, 64, 32, 16, 8):
        if tb <= batch and batch % tb == 0:
            return tb
    return batch


def mlp_gate_forward(Zi, Hi, W1, W2, bias_pad, out_dim, *, block_b=512):
    """softmax(leaky_relu(concat(Zi, Hi) @ W.T + b), axis=1) without the concat."""
    B, D1 = Zi.shape
    _, D2 = Hi.shape
    opad = W1.shape[1]
    tb = _pick_batch_tile(B, block_b)

    out_padded = pl.pallas_call(
        functools.partial(_mlp_gate_kernel, valid_out=out_dim),
        out_shape=jax.ShapeDtypeStruct((B, opad), Zi.dtype),
        grid_spec=pl.GridSpec(
            grid=(pl.cdiv(B, tb),),
            in_specs=[
                pl.BlockSpec((tb, D1), lambda i: (i, 0)),      # Zi tile (pipelined)
                pl.BlockSpec((tb, D2), lambda i: (i, 0)),      # Hi tile (pipelined)
                pl.BlockSpec((D1, opad), lambda i: (0, 0)),    # W1: VMEM-resident
                pl.BlockSpec((D2, opad), lambda i: (0, 0)),    # W2: VMEM-resident
                pl.BlockSpec((1, opad), lambda i: (0, 0)),     # bias: VMEM-resident
            ],
            out_specs=pl.BlockSpec((tb, opad), lambda i: (i, 0)),
        ),
        compiler_params=pltpu.CompilerParams(
            dimension_semantics=("parallel",)),
    )(Zi, Hi, W1, W2, bias_pad)

    return out_padded[:, :out_dim]


def _reference(Zi, Hi, weight, bias):
    x = jnp.concatenate([Zi.astype(jnp.float32), Hi.astype(jnp.float32)], axis=1)
    y = x @ weight.T + bias
    y = jnp.where(y >= 0, y, 0.01 * y)
    return jax.nn.softmax(y, axis=1)


if __name__ == "__main__":
    key = jax.random.PRNGKey(0)
    k1, k2, k3, k4 = jax.random.split(key, 4)

    # Shapes implied by the module: Zi/Hi are [user, latdim], the gate MLP is
    # Linear(latdim*2 -> 2). Kept small but batch-tileable (2 grid steps @ 512).
    B, latdim, O = 1024, 128, 2
    D1 = D2 = latdim
    input_dim = D1 + D2

    Zi = jax.random.normal(k1, (B, D1), dtype=jnp.float32)
    Hi = jax.random.normal(k2, (B, D2), dtype=jnp.float32)

    # Deterministic nn.Linear-like init (uniform in +/- 1/sqrt(fan_in)).
    bound = 1.0 / math.sqrt(input_dim)
    weight = jax.random.uniform(k3, (O, input_dim), minval=-bound, maxval=bound,
                                dtype=jnp.float32)
    bias = jax.random.uniform(k4, (O,), minval=-bound, maxval=bound,
                              dtype=jnp.float32)

    # --- f32 path -----------------------------------------------------------
    W1, W2, b_pad, out_dim = prepare_mlp_params(weight, bias, D1)
    out = mlp_gate_forward(Zi, Hi, W1, W2, b_pad, out_dim, block_b=512)
    out = jax.block_until_ready(out)

    ref = _reference(Zi, Hi, weight, bias)
    assert out.shape == (B, O)
    assert bool(jnp.all(jnp.isfinite(out)))
    # approx=True reciprocal -> loosen tolerance vs the exact reference.
    assert jnp.allclose(out, ref, atol=5e-3, rtol=5e-3), "mismatch vs reference"
    assert jnp.allclose(jnp.sum(out, axis=1), 1.0, atol=5e-3), \
        "softmax rows must sum to ~1"

    # --- bf16 operand path (MXU-friendly on v6e/v7x), f32 accumulation ------
    Zb = Zi.astype(jnp.bfloat16)
    Hb = Hi.astype(jnp.bfloat16)
    W1b, W2b, b_pad_b, _ = prepare_mlp_params(weight, bias, D1,
                                              operand_dtype=jnp.bfloat16)
    out_b = mlp_gate_forward(Zb, Hb, W1b, W2b, b_pad_b, out_dim, block_b=512)
    out_b = jax.block_until_ready(out_b)
    out_b_f32 = out_b.astype(jnp.float32)
    assert out_b.shape == (B, O)
    assert bool(jnp.all(jnp.isfinite(out_b_f32)))
    assert jnp.allclose(out_b_f32, ref, atol=5e-2), "bf16 path too far from reference"
    assert jnp.allclose(jnp.sum(out_b_f32, axis=1), 1.0, atol=5e-2)

    print("KERNEL_OK")
</pallas_src>

<mosaic_0001>
module attributes {stable_mosaic.version = 11 : i64} {
  func.func @_mlp_gate_kernel(%arg0: i32, %arg1: memref<512x128xf32, #tpu.memory_space<vmem>>, %arg2: memref<512x128xf32, #tpu.memory_space<vmem>>, %arg3: memref<128x128xf32, #tpu.memory_space<vmem>>, %arg4: memref<128x128xf32, #tpu.memory_space<vmem>>, %arg5: memref<1x128xf32, #tpu.memory_space<vmem>>, %arg6: memref<512x128xf32, #tpu.memory_space<vmem>>) attributes {dimension_semantics = [#tpu.dimension_semantics<parallel>], iteration_bounds = array<i64: 2>, scalar_prefetch = 0 : i64, scratch_operands = 0 : i64, tpu.core_type = #tpu.core_type<tc>, window_params = [{transform_indices = @transform_0, window_bounds = array<i64: 512, 128>}, {transform_indices = @transform_1, window_bounds = array<i64: 512, 128>}, {pipeline_mode = #tpu.pipeline_mode<synchronous>, transform_indices = @transform_2, window_bounds = array<i64: 128, 128>}, {pipeline_mode = #tpu.pipeline_mode<synchronous>, transform_indices = @transform_3, window_bounds = array<i64: 128, 128>}, {pipeline_mode = #tpu.pipeline_mode<synchronous>, transform_indices = @transform_4, window_bounds = array<i64: 1, 128>}, {transform_indices = @transform_5, window_bounds = array<i64: 512, 128>}]} {
    %c0 = arith.constant 0 : index
    %c0_0 = arith.constant 0 : index
    %0 = vector.load %arg1[%c0, %c0_0] : memref<512x128xf32, #tpu.memory_space<vmem>>, vector<512x128xf32>
    %c0_1 = arith.constant 0 : index
    %c0_2 = arith.constant 0 : index
    %1 = vector.load %arg3[%c0_1, %c0_2] : memref<128x128xf32, #tpu.memory_space<vmem>>, vector<128x128xf32>
    %cst = arith.constant dense<0.000000e+00> : vector<512x128xf32>
    %2 = tpu.matmul %0, %1, %cst {dimension_numbers = #tpu.dot_dimension_numbers<[1], [0], [0], [1], [0, 0, 1, 1], [], []>} : vector<512x128xf32>, vector<128x128xf32>, vector<512x128xf32> -> vector<512x128xf32>
    %c0_3 = arith.constant 0 : index
    %c0_4 = arith.constant 0 : index
    %3 = vector.load %arg2[%c0_3, %c0_4] : memref<512x128xf32, #tpu.memory_space<vmem>>, vector<512x128xf32>
    %c0_5 = arith.constant 0 : index
    %c0_6 = arith.constant 0 : index
    %4 = vector.load %arg4[%c0_5, %c0_6] : memref<128x128xf32, #tpu.memory_space<vmem>>, vector<128x128xf32>
    %cst_7 = arith.constant dense<0.000000e+00> : vector<512x128xf32>
    %5 = tpu.matmul %3, %4, %cst_7 {dimension_numbers = #tpu.dot_dimension_numbers<[1], [0], [0], [1], [0, 0, 1, 1], [], []>} : vector<512x128xf32>, vector<128x128xf32>, vector<512x128xf32> -> vector<512x128xf32>
    %6 = arith.addf %2, %5 : vector<512x128xf32>
    %c0_8 = arith.constant 0 : index
    %c0_9 = arith.constant 0 : index
    %7 = vector.load %arg5[%c0_8, %c0_9] : memref<1x128xf32, #tpu.memory_space<vmem>>, vector<1x128xf32>
    %8 = vector.broadcast %7 : vector<1x128xf32> to vector<512x128xf32>
    %9 = arith.addf %6, %8 : vector<512x128xf32>
    %cst_10 = arith.constant 0.000000e+00 : f32
    %10 = vector.broadcast %cst_10 : f32 to vector<512x128xf32>
    %11 = arith.cmpf oge, %9, %10 : vector<512x128xf32>
    %cst_11 = arith.constant 0.00999999977 : f32
    %12 = vector.broadcast %cst_11 : f32 to vector<512x128xf32>
    %13 = arith.mulf %12, %9 : vector<512x128xf32>
    %14 = arith.select %11, %9, %13 : vector<512x128xi1>, vector<512x128xf32>
    %15 = tpu.iota {dimensions = array<i32: 1>} : vector<512x128xi32>
    %c2_i32 = arith.constant 2 : i32
    %16 = vector.broadcast %c2_i32 : i32 to vector<512x128xi32>
    %17 = arith.cmpi slt, %15, %16 : vector<512x128xi32>
    %cst_12 = arith.constant 0xFF800000 : f32
    %18 = vector.broadcast %cst_12 : f32 to vector<512x128xf32>
    %19 = arith.select %17, %14, %18 : vector<512x128xi1>, vector<512x128xf32>
    %cst_13 = arith.constant dense<0xFF800000> : vector<512xf32>
    %20 = vector.multi_reduction <maximumf>, %19, %cst_13 [1] : vector<512x128xf32> to vector<512xf32>
    %21 = vector.shape_cast %20 : vector<512xf32> to vector<512x1xf32>
    %22 = vector.broadcast %21 : vector<512x1xf32> to vector<512x128xf32>
    %23 = arith.subf %19, %22 : vector<512x128xf32>
    %24 = math.exp %23 : vector<512x128xf32>
    %cst_14 = arith.constant dense<0.000000e+00> : vector<512xf32>
    %25 = vector.multi_reduction <add>, %24, %cst_14 [1] : vector<512x128xf32> to vector<512xf32>
    %26 = vector.shape_cast %25 : vector<512xf32> to vector<512x1xf32>
    %27 = tpu.reciprocal %26 {approx = true} : vector<512x1xf32> -> vector<512x1xf32>
    %28 = vector.broadcast %27 : vector<512x1xf32> to vector<512x128xf32>
    %29 = arith.mulf %24, %28 : vector<512x128xf32>
    %c0_15 = arith.constant 0 : index
    %c0_16 = arith.constant 0 : index
    %30 = vector.load %arg6[%c0_15, %c0_16] : memref<512x128xf32, #tpu.memory_space<vmem>>, vector<512x128xf32>
    tpu.vector_store %arg6[%c0_15, %c0_16], %29 {strides = array<i32>} : memref<512x128xf32, #tpu.memory_space<vmem>>, vector<512x128xf32>,
    return
  }
  func.func @transform_0(%arg0: i32) -> (i32, i32) {
    %c0_i32 = arith.constant 0 : i32
    %c0_i32_0 = arith.constant 0 : i32
    return %arg0, %c0_i32 : i32, i32
  }
  func.func @transform_1(%arg0: i32) -> (i32, i32) {
    %c0_i32 = arith.constant 0 : i32
    %c0_i32_0 = arith.constant 0 : i32
    return %arg0, %c0_i32 : i32, i32
  }
  func.func @transform_2(%arg0: i32) -> (i32, i32) {
    %c0_i32 = arith.constant 0 : i32
    %c0_i32_0 = arith.constant 0 : i32
    %c0_i32_1 = arith.constant 0 : i32
    return %c0_i32, %c0_i32_0 : i32, i32
  }
  func.func @transform_3(%arg0: i32) -> (i32, i32) {
    %c0_i32 = arith.constant 0 : i32
    %c0_i32_0 = arith.constant 0 : i32
    %c0_i32_1 = arith.constant 0 : i32
    return %c0_i32, %c0_i32_0 : i32, i32
  }
  func.func @transform_4(%arg0: i32) -> (i32, i32) {
    %c0_i32 = arith.constant 0 : i32
    %c0_i32_0 = arith.constant 0 : i32
    %c0_i32_1 = arith.constant 0 : i32
    return %c0_i32, %c0_i32_0 : i32, i32
  }
  func.func @transform_5(%arg0: i32) -> (i32, i32) {
    %c0_i32 = arith.constant 0 : i32
    %c0_i32_0 = arith.constant 0 : i32
    return %arg0, %c0_i32 : i32, i32
  }
}

</mosaic_0001>

<bundles_post_ra>
// kernel: tpu_custom_call.1
= control target key start
LH: loop header
LB: loop body
LE: loop exit
PB: predicated region body
PF: predicated region fallthrough
CT: control target
= control target key end

     0   :  { %s3773_s0 = inlined_call_operand.hbm [shape: f32[1024,128], index: 0, kind: input, shape index: {}]   ;;  %s3774_s1 = inlined_call_operand.hbm [shape: f32[1024,128], index: 1, kind: input, shape index: {}]   ;;  %s3775_s2 = inlined_call_operand.hbm [shape: f32[128,128], index: 2, kind: input, shape index: {}]   ;;  %s3776_s3 = inlined_call_operand.hbm [shape: f32[128,128], index: 3, kind: input, shape index: {}]   ;;  %s3777_s4 = inlined_call_operand.vmem [shape: f32[1,128], index: 4, kind: input, shape index: {}]   ;;  %s3778_s5 = inlined_call_operand.hbm [shape: f32[1024,128], index: 5, kind: output, shape index: {}]  }
   0x1   :  { %3799 = sst [smem:[#allocation33_spill]] %s3773_s0 }
   0x2   :  { %3800 = sst [smem:[#allocation34_spill]] %s3775_s2 }
   0x3   :  { %3801 = sst [smem:[#allocation35_spill]] %s3776_s3 }
   0x4   :  { %10 = vsyncpa [#allocation3], 0 }
   0x5   :  { %12 = vsyncpa [#allocation3 + $0x1], 0 }
   0x6   :  { %13 = vsyncpa [#allocation6], 0 }
   0x7   :  { %15 = vsyncpa [#allocation6 + $0x1], 0 }
   0x8   :  { %16 = vsyncpa [#allocation9], 0 }
   0x9   :  { %17 = vsyncpa [#allocation4], 0 }
   0xa   :  { %19 = vsyncpa [#allocation4 + $0x1], 0  ;;  %s2626_s18 = smov 0   ;;  %s2628_s19 = smov 0  }
   0xb   :  { %s2630_s20 = smov 0   ;;  %s2632_s21 = smov 0  }
   0xc LB: > { %s2647_s22 = sadd.s32 4294967295, %s2588_s21   ;;  %s1999_s23 = sadd.s32 4294967294, %s2588_s21   ;;  %s2588_s21 = sphi %s2632_s21, %s3850_s21   ;;  %s2584_s20 = sphi %s2630_s20, %s3849_s20   ;;  %s2580_s19 = sphi %s2628_s19, %s3848_s19   ;;  %s2576_s18 = sphi %s2626_s18, %s3847_s18  }
   0xd   : > { %p45_p0 = scmp.ne.s32.totalorder %s2580_s19, %s2576_s18  ;;  %p46_p1 = scmp.eq.s32.totalorder %s2647_s22, 0 }
   0xe   : > { %p158_p2 = scmp.eq.s32.totalorder %s2647_s22, 1  ;;  %p164_p3 = scmp.eq.s32.totalorder %s1999_s23, 1 }
   0xf   : > { %p2656_p4 = por %p46_p1, %p45_p0  ;;  %p2000_p5 = scmp.ge.s32.totalorder %s2588_s21, 1 }
  0x10   : > { %p2661_p6 = por %p164_p3, %p45_p0  ;;  %p171_p7 = scmp.lt.s32.totalorder %s2588_s21, 3 }
  0x11   : > { %s3804_s2 = sld [smem:[#allocation34_spill]]  ;;  %s2590_s30 = smov [#allocation7]  }
  0x12   : > { %p2669_p8 = pnand %p2000_p5, %p171_p7  ;;  %s184_s6 = sshll.u32 %s2590_s30, 4  ;;  %s185_s6 = int_to_ptr.vmem [resolvable:$true] %s184_s6 }
  0x13   : > { %s3806_s3 = sld [smem:[#allocation35_spill]]  ;;  %s3779_s10 = smov 128  }
  0x14   : > { %p2070_p9 = pneg %p2669_p8  ;;  %s3781_s11 = smov 8  }
  0x15   : > { %s2593_s12 = smov [#allocation8]   ;;  %s2688_s14 = sadd.s32 1, %s2588_s21  }
  0x16   : > { %p2071_p10 = pnand %p2070_p9, %p46_p1  ;;  %s198_s13 = sshll.u32 %s2593_s12, 4  ;;  %s199_s13 = int_to_ptr.vmem [resolvable:$true] %s198_s13 }
  0x17   : > { %s182_s28 = sshll.u32 %s3804_s2, 4  ;;  %s32_s15 = sadd.s32 1, %s2584_s20  ;;  %s183_s28 = int_to_ptr.hbm [resolvable:$true] %s182_s28 }
  0x18   : > { %2073 = dma.hbm_to_vmem [thread:$0]  (!%p2071_p10), %s183_s28, 2048, %s185_s6, [#allocation6], %s3779_s10, %s3779_s10, %s3781_s11  }
  0x19   : > { %s196_s9 = sshll.u32 %s3806_s3, 4  ;;  %s29_s16 = ssub.s32 %s2588_s21, %s2688_s14  ;;  %s197_s9 = int_to_ptr.hbm [resolvable:$true] %s196_s9 }
  0x1a   : > { %2076 = dma.hbm_to_vmem [thread:$0]  (!%p2071_p10), %s197_s9, 2048, %s199_s13, [#allocation9], %s3779_s10, %s3779_s10, %s3781_s11  }
  0x1b   : > { %p39_p12 = scmp.ne.s32.totalorder %s2584_s20, %s2580_s19  ;;  %p30_p13 = scmp.eq.s32.totalorder %s29_s16, 0 }
  0x1c   : > { %p40_p0 = scmp.eq.s32.totalorder %s2588_s21, 0  ;;  %p2090_p5 = scmp.lt.s32.totalorder %s2588_s21, 2 }
  0x1d   : > { %p2698_p3 = por %p158_p2, %p39_p12  ;;  %s215_s26 = sand.u32 1, %s2584_s20  }
  0x1e   : > { %s2704_s23 = scalar_select %p30_p13, %s2584_s20, %s32_s15  }
  0x1f   : > { %p41_p7 = por %p40_p0, %p39_p12  ;;  %s2707_s27 = sshll.u32 %s215_s26, 9 }
  0x20   : > { %3808 = sst [smem:[#allocation16_spill]] %s2704_s23  ;;  %s2021_s28 = sshll.u32 %s2588_s21, 9 }
  0x21   : > { %s3809_s0 = sld [smem:[#allocation33_spill]]  ;;  %s219_s8 = scalar_lea.vmem [#allocation2], %s2707_s27 }
  0x22   : > { %s227_s9 = sshll.u32 %s219_s8, 4  ;;  %p2714_p2 = pnand %p2090_p5, %p41_p7  ;;  %s228_s9 = int_to_ptr.vmem [resolvable:$true] %s227_s9 }
  0x23   : > { %s246_s10 = scalar_lea.hbm %s3774_s1, %s2021_s28  ;;  %s216_s2 = scalar_lea.sflag [#allocation3], %s215_s26 }
  0x24   : > { %s247_s11 = sshll.u32 %s246_s10, 4  ;;  %p2454_p10 = pneg %p2714_p2  ;;  %s248_s11 = int_to_ptr.hbm [resolvable:$true] %s247_s11 }
  0x27   : > { %s224_s7 = scalar_lea.hbm %s3809_s0, %s2021_s28  ;;  %s2457_s8 = scalar_lea.hbm %s3809_s0, 1024 }
  0x28   : > { %s225_s12 = sshll.u32 %s224_s7, 4  ;;  %s226_s12 = int_to_ptr.hbm [resolvable:$true] %s225_s12 }
  0x29   : > { %s2450_s3 = sshra.s32 %s226_s12, 4  ;;  %s2451_s3 = int_to_ptr.hbm [resolvable:$true] %s2450_s3 }
  0x2a   : > { %s2452_s30 = scalar_lea.hbm %s2451_s3, 512  ;;  %p2458_p0 = scmp.lt.s32.totalorder %s2451_s3, %s3809_s0 }
  0x2b   : > { %p2453_p9 = scmp.ne.s32.totalorder %s2451_s3, %s2452_s30  ;;  %p2459_p5 = scmp.lt.s32.totalorder %s2457_s8, %s2452_s30 }
  0x2d   : > { %p2455_p12 = pnand %p2454_p10, %p2453_p9  ;;  %p2460_p7 = por %p2459_p5, %p2458_p0 }
  0x2f   : > { %p2456_p13 = pneg %p2455_p12 }
  0x31   : > { %p2461_p11 = pnand %p2460_p7, %p2456_p13 }
  0x33   : > { %2464 = shalt.err (!%p2461_p11)
}
  0x34   : > { %s3811_s10 = smov 8   ;;  %s3812_s26 = smov 128  }
  0x35   : > { %2080 = dma.hbm_to_vmem [thread:$0]  (!%p2714_p2), %s226_s12, 8192, %s228_s9, %s216_s2, %s3812_s26, %s3812_s26, %s3811_s10  }
  0x36   : > { %s241_s28 = scalar_lea.vmem [#allocation5], %s2707_s27  ;;  %s237_s7 = sand.u32 1, %s2588_s21  }
  0x37   : > { %s249_s6 = sshll.u32 %s241_s28, 4  ;;  %s238_s15 = scalar_lea.sflag [#allocation6], %s237_s7  ;;  %s250_s6 = int_to_ptr.vmem [resolvable:$true] %s249_s6 }
  0x38   : > { %s2480_s3 = sshra.s32 %s248_s11, 4  ;;  %s2487_s0 = scalar_lea.hbm %s3774_s1, 1024  ;;  %s2481_s3 = int_to_ptr.hbm [resolvable:$true] %s2480_s3 }
  0x39   : > { %s2482_s30 = scalar_lea.hbm %s2481_s3, 512  ;;  %p2488_p13 = scmp.lt.s32.totalorder %s2481_s3, %s3774_s1 }
  0x3a   : > { %p2483_p9 = scmp.ne.s32.totalorder %s2481_s3, %s2482_s30  ;;  %p2489_p0 = scmp.lt.s32.totalorder %s2487_s0, %s2482_s30 }
  0x3c   : > { %p2485_p11 = pnand %p2483_p9, %p2454_p10  ;;  %p2490_p5 = por %p2489_p0, %p2488_p13 }
  0x3e   : > { %p2486_p12 = pneg %p2485_p11 }
  0x40   : > { %p2491_p7 = pnand %p2490_p5, %p2486_p12 }
  0x42   : > { %2494 = shalt.err (!%p2491_p7)
}
  0x43   : > { %2083 = dma.hbm_to_vmem [thread:$0]  (!%p2714_p2), %s248_s11, 8192, %s250_s6, %s238_s15, %s3812_s26, %s3812_s26, %s3811_s10  }
  0x44   : > { %261 = sbr.rel (%p2669_p8) target bundleno = 811 (0x32b), region = 40 }
  0x49   : > { %s2756_s27 = sand.u32 1, %s2580_s19  }
  0x4a   : > { %s2759_s23 = sshll.u32 %s2756_s27, 9  ;;  %s264_s0 = scalar_lea.sflag [#allocation3], %s2756_s27 }
  0x4b   : > { %s2763_s9 = scalar_lea.vmem [#allocation2], %s2759_s23 }
  0x4c   : > { %2555 = dma.done.wait (%p2656_p4), %s264_s0, 8192  }
  0x4d   : > { %2557 = vsyncadd (%p2656_p4), %s264_s0, 4294959104  ;;  %s273_s29 = sand.u32 1, %s2647_s22   ;;  %s2771_s12 = scalar_lea.vmem [#allocation5], %s2759_s23 }
  0x4e   : > { %s274_s11 = scalar_lea.sflag [#allocation6], %s273_s29 }
  0x4f   : > { %2559 = dma.done.wait (%p2656_p4), %s274_s11, 8192  }
  0x50   : > { %2561 = vsyncadd (%p2656_p4), %s274_s11, 4294959104 }
  0x51   : > { %2563 = dma.done.wait (%p46_p1), [#allocation6], 2048  }
  0x52   : > { %2565 = vsyncadd (%p46_p1), [#allocation6], 4294965248 }
  0x53   : > { %2567 = dma.done.wait (%p46_p1), [#allocation9], 2048  }
  0x54   : > { %2569 = vsyncadd (%p46_p1), [#allocation9], 4294965248  ;;  %v482_v0 = vld [vmem:[#allocation8 + $0x78] sm:$0xff]  ;;  %v481_v2 = vld [vmem:[#allocation8 + $0x70] sm:$0xff]  ;;  %s3375_s28 = scalar_lea.vmem [#allocation10], %s2759_s23  ;;  %s2023_s6 = sshll.u32 %s2647_s22, 9 }
  0x55   : > { %v402_v1 = vld [vmem:[#allocation7 + $0x78] sm:$0xff]  ;;  %483 = vmatpush.msra.mxu0 %v482_v0  ;;  %2024 = vmatpush.msra.mxu2 %v482_v0  ;;  %v401_v3 = vld [vmem:[#allocation7 + $0x70] sm:$0xff]  ;;  %v480_v4 = vld [vmem:[#allocation8 + $0x68] sm:$0xff]  ;;  %s1880_s3 = scalar_lea.hbm %s3778_s5, %s2023_s6  ;;  %s1881_s30 = sshll.u32 %s3375_s28, 4  ;;  %s1882_s30 = int_to_ptr.vmem [resolvable:$true] %s1881_s30 }
  0x56   : > { %692 = vmatpush.msra.mxu1 %v402_v1  ;;  %2040 = vmatpush.msra.mxu3 %v402_v1  ;;  %v400_v5 = vld [vmem:[#allocation7 + $0x68] sm:$0xff]  ;;  %v479_v6 = vld [vmem:[#allocation8 + $0x60] sm:$0xff]  ;;  %v478_v8 = vld [vmem:[#allocation8 + $0x58] sm:$0xff]  ;;  %s1883_s8 = sshll.u32 %s1880_s3, 4  ;;  %s1869_s22 = scalar_lea.sflag [#allocation4], %s2756_s27  ;;  %s1884_s8 = int_to_ptr.hbm [resolvable:$true] %s1883_s8 }
  0x57   : > { %484 = vmatpush.msra.mxu0 %v481_v2  ;;  %2025 = vmatpush.msra.mxu2 %v481_v2  ;;  %v399_v7 = vld [vmem:[#allocation7 + $0x60] sm:$0xff]  ;;  %v398_v9 = vld [vmem:[#allocation7 + $0x58] sm:$0xff]  ;;  %v477_v10 = vld [vmem:[#allocation8 + $0x50] sm:$0xff]  ;;  %s2524_s16 = sshra.s32 %s1884_s8, 4  ;;  %s2525_s16 = int_to_ptr.hbm [resolvable:$true] %s2524_s16 }
  0x58   : > { %693 = vmatpush.msra.mxu1 %v401_v3  ;;  %2041 = vmatpush.msra.mxu3 %v401_v3  ;;  %v397_v11 = vld [vmem:[#allocation7 + $0x50] sm:$0xff]  ;;  %v476_v12 = vld [vmem:[#allocation8 + $0x48] sm:$0xff]  ;;  %v475_v14 = vld [vmem:[#allocation8 + $0x40] sm:$0xff]  ;;  %s2526_s2 = scalar_lea.hbm %s2525_s16, 512  ;;  %p2531_p2 = scmp.lt.s32.totalorder %s2525_s16, %s3778_s5 }
  0x59   : > { %485 = vmatpush.msra.mxu0 %v480_v4  ;;  %2026 = vmatpush.msra.mxu2 %v480_v4  ;;  %v396_v13 = vld [vmem:[#allocation7 + $0x48] sm:$0xff]  ;;  %v395_v15 = vld [vmem:[#allocation7 + $0x40] sm:$0xff]  ;;  %v474_v16 = vld [vmem:[#allocation8 + $0x38] sm:$0xff]  ;;  %p2527_p1 = scmp.ne.s32.totalorder %s2525_s16, %s2526_s2 }
  0x5a   : > { %694 = vmatpush.msra.mxu1 %v400_v5  ;;  %2042 = vmatpush.msra.mxu3 %v400_v5  ;;  %v394_v17 = vld [vmem:[#allocation7 + $0x38] sm:$0xff]  ;;  %v473_v18 = vld [vmem:[#allocation8 + $0x30] sm:$0xff]  ;;  %v472_v20 = vld [vmem:[#allocation8 + $0x28] sm:$0xff] }
  0x5b   : > { %486 = vmatpush.msra.mxu0 %v479_v6  ;;  %2027 = vmatpush.msra.mxu2 %v479_v6  ;;  %v393_v19 = vld [vmem:[#allocation7 + $0x30] sm:$0xff]  ;;  %v392_v21 = vld [vmem:[#allocation7 + $0x28] sm:$0xff]  ;;  %v471_v22 = vld [vmem:[#allocation8 + $0x20] sm:$0xff]  ;;  %p2528_p4 = pnand %p2527_p1, %p2698_p3 }
  0x5c   : > { %695 = vmatpush.msra.mxu1 %v399_v7  ;;  %2043 = vmatpush.msra.mxu3 %v399_v7  ;;  %v391_v23 = vld [vmem:[#allocation7 + $0x20] sm:$0xff]  ;;  %v470_v24 = vld [vmem:[#allocation8 + $0x18] sm:$0xff]  ;;  %v469_v26 = vld [vmem:[#allocation8 + $0x10] sm:$0xff] }
  0x5d   : > { %487 = vmatpush.msra.mxu0 %v478_v8  ;;  %2028 = vmatpush.msra.mxu2 %v478_v8  ;;  %v390_v25 = vld [vmem:[#allocation7 + $0x18] sm:$0xff]  ;;  %v389_v27 = vld [vmem:[#allocation7 + $0x10] sm:$0xff]  ;;  %v468_v28 = vld [vmem:[#allocation8 + $0x8] sm:$0xff]  ;;  %p2529_p8 = pneg %p2528_p4 }
  0x5e   : > { %696 = vmatpush.msra.mxu1 %v398_v9  ;;  %2044 = vmatpush.msra.mxu3 %v398_v9  ;;  %v388_v29 = vld [vmem:[#allocation7 + $0x8] sm:$0xff]  ;;  %v467_v30 = vld [vmem:[#allocation8] sm:$0xff]  ;;  %v405_v40 = vld [vmem:[%s2771_s12 + $0x10] sm:$0xff] }
  0x5f   : > { %488 = vmatpush.msra.mxu0 %v477_v10  ;;  %2029 = vmatpush.msra.mxu2 %v477_v10  ;;  %v387_v31 = vld [vmem:[#allocation7] sm:$0xff]  ;;  %v404_v36 = vld [vmem:[%s2771_s12 + $0x8] sm:$0xff]  ;;  %v437_v41 = vld [vmem:[%s2771_s12 + $0x110] sm:$0xff] }
  0x60   : > { %697 = vmatpush.msra.mxu1 %v397_v11  ;;  %2045 = vmatpush.msra.mxu3 %v397_v11  ;;  %v403_v32 = vld [vmem:[%s2771_s12] sm:$0xff]  ;;  %v436_v37 = vld [vmem:[%s2771_s12 + $0x108] sm:$0xff]  ;;  %v325_v42 = vld [vmem:[%s2763_s9 + $0x10] sm:$0xff] }
  0x61   : > { %489 = vmatpush.msra.mxu0 %v476_v12  ;;  %2030 = vmatpush.msra.mxu2 %v476_v12  ;;  %v435_v33 = vld [vmem:[%s2771_s12 + $0x100] sm:$0xff]  ;;  %v324_v38 = vld [vmem:[%s2763_s9 + $0x8] sm:$0xff]  ;;  %v357_v43 = vld [vmem:[%s2763_s9 + $0x110] sm:$0xff] }
  0x62   : > { %698 = vmatpush.msra.mxu1 %v396_v13  ;;  %2046 = vmatpush.msra.mxu3 %v396_v13  ;;  %v323_v34 = vld [vmem:[%s2763_s9] sm:$0xff]  ;;  %v356_v39 = vld [vmem:[%s2763_s9 + $0x108] sm:$0xff]  ;;  %v406_v44 = vld [vmem:[%s2771_s12 + $0x18] sm:$0xff] }
  0x63   : > { %490 = vmatpush.msra.mxu0 %v475_v14  ;;  %2031 = vmatpush.msra.mxu2 %v475_v14  ;;  %v355_v35 = vld [vmem:[%s2763_s9 + $0x100] sm:$0xff]  ;;  %v438_v45 = vld [vmem:[%s2771_s12 + $0x118] sm:$0xff]  ;;  %v408_v52 = vld [vmem:[%s2771_s12 + $0x28] sm:$0xff] }
  0x64   : > { %699 = vmatpush.msra.mxu1 %v395_v15  ;;  %2047 = vmatpush.msra.mxu3 %v395_v15  ;;  %v326_v46 = vld [vmem:[%s2763_s9 + $0x18] sm:$0xff]  ;;  %v407_v48 = vld [vmem:[%s2771_s12 + $0x20] sm:$0xff]  ;;  %v440_v53 = vld [vmem:[%s2771_s12 + $0x128] sm:$0xff] }
  0x65   : > { %491 = vmatpush.msra.mxu0 %v474_v16  ;;  %2032 = vmatpush.msra.mxu2 %v474_v16  ;;  %v358_v47 = vld [vmem:[%s2763_s9 + $0x118] sm:$0xff]  ;;  %v439_v49 = vld [vmem:[%s2771_s12 + $0x120] sm:$0xff]  ;;  %v328_v54 = vld [vmem:[%s2763_s9 + $0x28] sm:$0xff] }
  0x66   : > { %700 = vmatpush.msra.mxu1 %v394_v17  ;;  %2048 = vmatpush.msra.mxu3 %v394_v17  ;;  %v327_v50 = vld [vmem:[%s2763_s9 + $0x20] sm:$0xff]  ;;  %v360_v55 = vld [vmem:[%s2763_s9 + $0x128] sm:$0xff]  ;;  %v409_v56 = vld [vmem:[%s2771_s12 + $0x30] sm:$0xff] }
  0x67   : > { %492 = vmatpush.msra.mxu0 %v473_v18  ;;  %2033 = vmatpush.msra.mxu2 %v473_v18  ;;  %v359_v51 = vld [vmem:[%s2763_s9 + $0x120] sm:$0xff]  ;;  %v441_v57 = vld [vmem:[%s2771_s12 + $0x130] sm:$0xff]  ;;  %v410_v60 = vld [vmem:[%s2771_s12 + $0x38] sm:$0xff] }
  0x68   : > { %701 = vmatpush.msra.mxu1 %v393_v19  ;;  %2049 = vmatpush.msra.mxu3 %v393_v19  ;;  %v329_v58 = vld [vmem:[%s2763_s9 + $0x30] sm:$0xff]  ;;  %v442_v61 = vld [vmem:[%s2771_s12 + $0x138] sm:$0xff]  ;;  %v411_v0 = vld [vmem:[%s2771_s12 + $0x40] sm:$0xff] }
  0x69   : > { %493 = vmatpush.msra.mxu0 %v472_v20  ;;  %2034 = vmatpush.msra.mxu2 %v472_v20  ;;  %v361_v59 = vld [vmem:[%s2763_s9 + $0x130] sm:$0xff]  ;;  %v330_v62 = vld [vmem:[%s2763_s9 + $0x38] sm:$0xff]  ;;  %v443_v1 = vld [vmem:[%s2771_s12 + $0x140] sm:$0xff] }
  0x6a   : > { %702 = vmatpush.msra.mxu1 %v392_v21  ;;  %2050 = vmatpush.msra.mxu3 %v392_v21  ;;  %v362_v63 = vld [vmem:[%s2763_s9 + $0x138] sm:$0xff]  ;;  %v331_v2 = vld [vmem:[%s2763_s9 + $0x40] sm:$0xff]  ;;  %v412_v4 = vld [vmem:[%s2771_s12 + $0x48] sm:$0xff] }
  0x6b   : > { %494 = vmatpush.msra.mxu0 %v471_v22  ;;  %2035 = vmatpush.msra.mxu2 %v471_v22  ;;  %v363_v3 = vld [vmem:[%s2763_s9 + $0x140] sm:$0xff]  ;;  %v444_v5 = vld [vmem:[%s2771_s12 + $0x148] sm:$0xff]  ;;  %v413_v8 = vld [vmem:[%s2771_s12 + $0x50] sm:$0xff] }
  0x6c   : > { %703 = vmatpush.msra.mxu1 %v391_v23  ;;  %2051 = vmatpush.msra.mxu3 %v391_v23  ;;  %v332_v6 = vld [vmem:[%s2763_s9 + $0x48] sm:$0xff]  ;;  %v445_v9 = vld [vmem:[%s2771_s12 + $0x150] sm:$0xff]  ;;  %v414_v12 = vld [vmem:[%s2771_s12 + $0x58] sm:$0xff] }
  0x6d   : > { %495 = vmatpush.msra.mxu0 %v470_v24  ;;  %2036 = vmatpush.msra.mxu2 %v470_v24  ;;  %v364_v7 = vld [vmem:[%s2763_s9 + $0x148] sm:$0xff]  ;;  %v333_v10 = vld [vmem:[%s2763_s9 + $0x50] sm:$0xff]  ;;  %v446_v13 = vld [vmem:[%s2771_s12 + $0x158] sm:$0xff] }
  0x6e   : > { %704 = vmatpush.msra.mxu1 %v390_v25  ;;  %2052 = vmatpush.msra.mxu3 %v390_v25  ;;  %v365_v11 = vld [vmem:[%s2763_s9 + $0x150] sm:$0xff]  ;;  %v334_v14 = vld [vmem:[%s2763_s9 + $0x58] sm:$0xff]  ;;  %v415_v16 = vld [vmem:[%s2771_s12 + $0x60] sm:$0xff] }
  0x6f   : > { %496 = vmatpush.msra.mxu0 %v469_v26  ;;  %2037 = vmatpush.msra.mxu2 %v469_v26  ;;  %v366_v15 = vld [vmem:[%s2763_s9 + $0x158] sm:$0xff]  ;;  %v447_v17 = vld [vmem:[%s2771_s12 + $0x160] sm:$0xff]  ;;  %v416_v20 = vld [vmem:[%s2771_s12 + $0x68] sm:$0xff] }
  0x70   : > { %705 = vmatpush.msra.mxu1 %v389_v27  ;;  %2053 = vmatpush.msra.mxu3 %v389_v27  ;;  %v335_v18 = vld [vmem:[%s2763_s9 + $0x60] sm:$0xff]  ;;  %v448_v21 = vld [vmem:[%s2771_s12 + $0x168] sm:$0xff]  ;;  %v417_v24 = vld [vmem:[%s2771_s12 + $0x70] sm:$0xff] }
  0x71   : > { %497 = vmatpush.msra.mxu0 %v468_v28  ;;  %2038 = vmatpush.msra.mxu2 %v468_v28  ;;  %v367_v19 = vld [vmem:[%s2763_s9 + $0x160] sm:$0xff]  ;;  %v336_v22 = vld [vmem:[%s2763_s9 + $0x68] sm:$0xff]  ;;  %v449_v25 = vld [vmem:[%s2771_s12 + $0x170] sm:$0xff] }
  0x72   : > { %706 = vmatpush.msra.mxu1 %v388_v29  ;;  %2054 = vmatpush.msra.mxu3 %v388_v29  ;;  %v368_v23 = vld [vmem:[%s2763_s9 + $0x168] sm:$0xff]  ;;  %v337_v26 = vld [vmem:[%s2763_s9 + $0x70] sm:$0xff]  ;;  %v418_v28 = vld [vmem:[%s2771_s12 + $0x78] sm:$0xff] }
  0x73   : > { %498 = vmatpush.msra.mxu0 %v467_v30  ;;  %2039 = vmatpush.msra.mxu2 %v467_v30  ;;  %v369_v27 = vld [vmem:[%s2763_s9 + $0x170] sm:$0xff]  ;;  %v450_v29 = vld [vmem:[%s2771_s12 + $0x178] sm:$0xff] }
  0x74   : > { %707 = vmatpush.msra.mxu1 %v387_v31  ;;  %2055 = vmatpush.msra.mxu3 %v387_v31  ;;  %v338_v30 = vld [vmem:[%s2763_s9 + $0x78] sm:$0xff] }
  0x75   : > { %499 = vmatmul.f32.vlgmr.msra.gmra.mxu0 %v403_v32  ;;  %595 = vmatmul.f32.vlgmr.msra.gmra.mxu2 %v435_v33  ;;  %v370_v31 = vld [vmem:[%s2763_s9 + $0x178] sm:$0xff]  ;;  %v1161_v32 = vlaneseq }
  0x76   : > { %708 = vmatmul.f32.vlgmr.msra.gmra.mxu1 %v323_v34  ;;  %804 = vmatmul.f32.vlgmr.msra.gmra.mxu3 %v355_v35  ;;  %v2852_v34 = vld [vmem:[%s3777_s4] ss:$0 sm:$0xff] }
  0x77   : > { %v419_v35 = vld [vmem:[%s2771_s12 + $0x80] sm:$0xff] }
  0x7d   : > { %502 = vmatmul.f32.gmra.mxu0 %v404_v36  ;;  %598 = vmatmul.f32.gmra.mxu2 %v436_v37  ;;  %v451_v36 = vld [vmem:[%s2771_s12 + $0x180] sm:$0xff] }
  0x7e   : > { %711 = vmatmul.f32.gmra.mxu1 %v324_v38  ;;  %807 = vmatmul.f32.gmra.mxu3 %v356_v39  ;;  %v339_v38 = vld [vmem:[%s2763_s9 + $0x80] sm:$0xff] }
  0x7f   : > { %v371_v39 = vld [vmem:[%s2763_s9 + $0x180] sm:$0xff] }
  0x85   : > { %505 = vmatmul.f32.gmra.mxu0 %v405_v40  ;;  %601 = vmatmul.f32.gmra.mxu2 %v437_v41  ;;  %v2858_v41 = vand.u32 127, %v1161_v32 }
  0x86   : > { %714 = vmatmul.f32.gmra.mxu1 %v325_v42  ;;  %810 = vmatmul.f32.gmra.mxu3 %v357_v43 }
  0x87   : > { %vm1163_vm1 = vcmp.lt.s32.totalorder %v2858_v41, 2 }
  0x8d   : > { %508 = vmatmul.f32.gmra.mxu0 %v406_v44  ;;  %604 = vmatmul.f32.gmra.mxu2 %v438_v45 }
  0x8e   : > { %717 = vmatmul.f32.gmra.mxu1 %v326_v46  ;;  %813 = vmatmul.f32.gmra.mxu3 %v358_v47 }
  0x95   : > { %511 = vmatmul.f32.gmra.mxu0 %v407_v48  ;;  %607 = vmatmul.f32.gmra.mxu2 %v439_v49  ;;  %v420_v49 = vld [vmem:[%s2771_s12 + $0x88] sm:$0xff] }
  0x96   : > { %720 = vmatmul.f32.gmra.mxu1 %v327_v50  ;;  %816 = vmatmul.f32.gmra.mxu3 %v359_v51  ;;  %v452_v50 = vld [vmem:[%s2771_s12 + $0x188] sm:$0xff] }
  0x9d   : > { %514 = vmatmul.f32.gmra.mxu0 %v408_v52  ;;  %610 = vmatmul.f32.gmra.mxu2 %v440_v53  ;;  %v340_v53 = vld [vmem:[%s2763_s9 + $0x88] sm:$0xff] }
  0x9e   : > { %723 = vmatmul.f32.gmra.mxu1 %v328_v54  ;;  %819 = vmatmul.f32.gmra.mxu3 %v360_v55  ;;  %v372_v54 = vld [vmem:[%s2763_s9 + $0x188] sm:$0xff] }
  0xa5   : > { %517 = vmatmul.f32.gmra.mxu0 %v409_v56  ;;  %613 = vmatmul.f32.gmra.mxu2 %v441_v57 }
  0xa6   : > { %726 = vmatmul.f32.gmra.mxu1 %v329_v58  ;;  %822 = vmatmul.f32.gmra.mxu3 %v361_v59 }
  0xad   : > { %520 = vmatmul.f32.gmra.mxu0 %v410_v60  ;;  %616 = vmatmul.f32.gmra.mxu2 %v442_v61 }
  0xae   : > { %729 = vmatmul.f32.gmra.mxu1 %v330_v62  ;;  %825 = vmatmul.f32.gmra.mxu3 %v362_v63 }
  0xb5   : > { %523 = vmatmul.f32.gmra.mxu0 %v411_v0  ;;  %619 = vmatmul.f32.gmra.mxu2 %v443_v1 }
  0xb6   : > { %732 = vmatmul.f32.gmra.mxu1 %v331_v2  ;;  %828 = vmatmul.f32.gmra.mxu3 %v363_v3  ;;  %v453_v3 = vld [vmem:[%s2771_s12 + $0x190] sm:$0xff] }
  0xbd   : > { %526 = vmatmul.f32.gmra.mxu0 %v412_v4  ;;  %622 = vmatmul.f32.gmra.mxu2 %v444_v5  ;;  %v421_v4 = vld [vmem:[%s2771_s12 + $0x90] sm:$0xff] }
  0xbe   : > { %735 = vmatmul.f32.gmra.mxu1 %v332_v6  ;;  %831 = vmatmul.f32.gmra.mxu3 %v364_v7  ;;  %v373_v7 = vld [vmem:[%s2763_s9 + $0x190] sm:$0xff] }
  0xc5   : > { %529 = vmatmul.f32.gmra.mxu0 %v413_v8  ;;  %625 = vmatmul.f32.gmra.mxu2 %v445_v9  ;;  %v341_v8 = vld [vmem:[%s2763_s9 + $0x90] sm:$0xff] }
  0xc6   : > { %738 = vmatmul.f32.gmra.mxu1 %v333_v10  ;;  %834 = vmatmul.f32.gmra.mxu3 %v365_v11 }
  0xcd   : > { %532 = vmatmul.f32.gmra.mxu0 %v414_v12  ;;  %628 = vmatmul.f32.gmra.mxu2 %v446_v13 }
  0xce   : > { %741 = vmatmul.f32.gmra.mxu1 %v334_v14  ;;  %837 = vmatmul.f32.gmra.mxu3 %v366_v15 }
  0xd5   : > { %535 = vmatmul.f32.gmra.mxu0 %v415_v16  ;;  %631 = vmatmul.f32.gmra.mxu2 %v447_v17 }
  0xd6   : > { %744 = vmatmul.f32.gmra.mxu1 %v335_v18  ;;  %840 = vmatmul.f32.gmra.mxu3 %v367_v19 }
  0xdd   : > { %538 = vmatmul.f32.gmra.mxu0 %v416_v20  ;;  %634 = vmatmul.f32.gmra.mxu2 %v448_v21  ;;  %v422_v20 = vld [vmem:[%s2771_s12 + $0x98] sm:$0xff] }
  0xde   : > { %747 = vmatmul.f32.gmra.mxu1 %v336_v22  ;;  %843 = vmatmul.f32.gmra.mxu3 %v368_v23  ;;  %v454_v21 = vld [vmem:[%s2771_s12 + $0x198] sm:$0xff] }
  0xe5   : > { %541 = vmatmul.f32.gmra.mxu0 %v417_v24  ;;  %637 = vmatmul.f32.gmra.mxu2 %v449_v25  ;;  %v342_v25 = vld [vmem:[%s2763_s9 + $0x98] sm:$0xff] }
  0xe6   : > { %750 = vmatmul.f32.gmra.mxu1 %v337_v26  ;;  %846 = vmatmul.f32.gmra.mxu3 %v369_v27  ;;  %v374_v26 = vld [vmem:[%s2763_s9 + $0x198] sm:$0xff] }
  0xed   : > { %544 = vmatmul.f32.gmra.mxu0 %v418_v28  ;;  %640 = vmatmul.f32.gmra.mxu2 %v450_v29 }
  0xee   : > { %753 = vmatmul.f32.gmra.mxu1 %v338_v30  ;;  %849 = vmatmul.f32.gmra.mxu3 %v370_v31 }
  0xf2   : > { %v500_v33 = vpop.f32.mrf.mxu0 }
  0xf3   : > { %v709_v37 = vpop.f32.mrf.mxu1 }
  0xf4   : > { %v710_v40 = vadd.f32 %v709_v37, %v500_v33  ;;  %v423_v37 = vld [vmem:[%s2771_s12 + $0xa0] sm:$0xff] }
  0xf5   : > { %547 = vmatmul.f32.gmra.mxu0 %v419_v35  ;;  %643 = vmatmul.f32.gmra.mxu2 %v451_v36 }
  0xf6   : > { %v905_v42 = vadd.f32 %v2852_v34, %v710_v40  ;;  %756 = vmatmul.f32.gmra.mxu1 %v339_v38  ;;  %852 = vmatmul.f32.gmra.mxu3 %v371_v39  ;;  %v455_v38 = vld [vmem:[%s2771_s12 + $0x1a0] sm:$0xff] }
  0xf8   : > { %v596_v43 = vpop.f32.mrf.mxu2  ;;  %vm969_vm0 = vcmp.ge.f32.partialorder %v905_v42, 0.0  ;;  %v1033_v44 = vmul.f32 0.01, %v905_v42 }
  0xf9   : > { %v805_v45 = vpop.f32.mrf.mxu3 }
  0xfa   : > { %v806_v46 = vadd.f32 %v805_v45, %v596_v43  ;;  %v503_v47 = vpop.f32.mrf.mxu0  ;;  %v1097_v48 = vsel %vm969_vm0, %v905_v42, %v1033_v44  ;;  %v343_v42 = vld [vmem:[%s2763_s9 + $0xa0] sm:$0xff] }
  0xfb   : > { %v712_v51 = vpop.f32.mrf.mxu1  ;;  %v2866_v52 = vsel %vm1163_vm1, %v1097_v48, -inf  ;;  %v375_v43 = vld [vmem:[%s2763_s9 + $0x1a0] sm:$0xff] }
  0xfc   : > { %v937_v55 = vadd.f32 %v2852_v34, %v806_v46  ;;  %v713_v56 = vadd.f32 %v712_v51, %v503_v47  ;;  %1228 = vmax.xlane.f32.xlu0 %v2866_v52 }
  0xfd   : > { %550 = vmatmul.f32.gmra.mxu0 %v420_v49  ;;  %646 = vmatmul.f32.gmra.mxu2 %v452_v50 }
  0xfe   : > { %v906_v57 = vadd.f32 %v2852_v34, %v713_v56  ;;  %vm1001_vm2 = vcmp.ge.f32.partialorder %v937_v55, 0.0  ;;  %v1065_v58 = vmul.f32 0.01, %v937_v55  ;;  %759 = vmatmul.f32.gmra.mxu1 %v340_v53  ;;  %855 = vmatmul.f32.gmra.mxu3 %v372_v54 }
 0x100   : > { %v599_v59 = vpop.f32.mrf.mxu2  ;;  %v1129_v60 = vsel %vm1001_vm2, %v937_v55, %v1065_v58  ;;  %vm970_vm3 = vcmp.ge.f32.partialorder %v906_v57, 0.0  ;;  %v1034_v61 = vmul.f32 0.01, %v906_v57  ;;  %v456_v58 = vld [vmem:[%s2771_s12 + $0x1a8] sm:$0xff] }
 0x101   : > { %v808_v62 = vpop.f32.mrf.mxu3  ;;  %v2875_v63 = vsel %vm1163_vm1, %v1129_v60, -inf }
 0x102   : > { %v809_v0 = vadd.f32 %v808_v62, %v599_v59  ;;  %1292 = vmax.xlane.f32.xlu2 %v2875_v63  ;;  %v506_v1 = vpop.f32.mrf.mxu0  ;;  %v1098_v2 = vsel %vm970_vm3, %v906_v57, %v1034_v61  ;;  %v424_v59 = vld [vmem:[%s2771_s12 + $0xa8] sm:$0xff] }
 0x103   : > { %v715_v5 = vpop.f32.mrf.mxu1  ;;  %v2882_v6 = vsel %vm1163_vm1, %v1098_v2, -inf  ;;  %v376_v62 = vld [vmem:[%s2763_s9 + $0x1a8] sm:$0xff] }
 0x104   : > { %v938_v9 = vadd.f32 %v2852_v34, %v809_v0  ;;  %v716_v10 = vadd.f32 %v715_v5, %v506_v1  ;;  %1230 = vmax.xlane.f32.xlu0 %v2882_v6  ;;  %v344_v0 = vld [vmem:[%s2763_s9 + $0xa8] sm:$0xff] }
 0x105   : > { %649 = vmatmul.f32.gmra.mxu2 %v453_v3  ;;  %553 = vmatmul.f32.gmra.mxu0 %v421_v4 }
 0x106   : > { %v907_v11 = vadd.f32 %v2852_v34, %v716_v10  ;;  %vm1002_vm4 = vcmp.ge.f32.partialorder %v938_v9, 0.0  ;;  %v1066_v12 = vmul.f32 0.01, %v938_v9  ;;  %858 = vmatmul.f32.gmra.mxu3 %v373_v7  ;;  %762 = vmatmul.f32.gmra.mxu1 %v341_v8 }
 0x108   : > { %v602_v13 = vpop.f32.mrf.mxu2  ;;  %vm971_vm5 = vcmp.ge.f32.partialorder %v907_v11, 0.0  ;;  %v1035_v14 = vmul.f32 0.01, %v907_v11  ;;  %v1130_v15 = vsel %vm1002_vm4, %v938_v9, %v1066_v12 }
 0x109   : > { %v811_v16 = vpop.f32.mrf.mxu3  ;;  %v2897_v24 = vsel %vm1163_vm1, %v1130_v15, -inf  ;;  %v425_v15 = vld [vmem:[%s2771_s12 + $0xb0] sm:$0xff] }
 0x10a   : > { %v812_v17 = vadd.f32 %v811_v16, %v602_v13  ;;  %v509_v18 = vpop.f32.mrf.mxu0  ;;  %v1099_v19 = vsel %vm971_vm5, %v907_v11, %v1035_v14  ;;  %v457_v16 = vld [vmem:[%s2771_s12 + $0x1b0] sm:$0xff] }
 0x10b   : > { %v718_v22 = vpop.f32.mrf.mxu1  ;;  %v2893_v23 = vsel %vm1163_vm1, %v1099_v19, -inf  ;;  %v377_v19 = vld [vmem:[%s2763_s9 + $0x1b0] sm:$0xff] }
 0x10c   : > { %v939_v27 = vadd.f32 %v2852_v34, %v812_v17  ;;  %v719_v28 = vadd.f32 %v718_v22, %v509_v18  ;;  %1232 = vmax.xlane.f32.xlu1 %v2893_v23  ;;  %1294 = vmax.xlane.f32.xlu0 %v2897_v24  ;;  %v345_v18 = vld [vmem:[%s2763_s9 + $0xb0] sm:$0xff] }
 0x10d   : > { %556 = vmatmul.f32.gmra.mxu0 %v422_v20  ;;  %652 = vmatmul.f32.gmra.mxu2 %v454_v21 }
 0x10e   : > { %vm1003_vm6 = vcmp.ge.f32.partialorder %v939_v27, 0.0  ;;  %v1067_v29 = vmul.f32 0.01, %v939_v27  ;;  %765 = vmatmul.f32.gmra.mxu1 %v342_v25  ;;  %861 = vmatmul.f32.gmra.mxu3 %v374_v26  ;;  %v908_v30 = vadd.f32 %v2852_v34, %v719_v28 }
 0x110   : > { %v605_v31 = vpop.f32.mrf.mxu2  ;;  %v1131_v32 = vsel %vm1003_vm6, %v939_v27, %v1067_v29  ;;  %v1036_v46 = vmul.f32 0.01, %v908_v30  ;;  %vm972_vm7 = vcmp.ge.f32.partialorder %v908_v30, 0.0 }
 0x111   : > { %v814_v33 = vpop.f32.mrf.mxu3  ;;  %v2909_v40 = vsel %vm1163_vm1, %v1131_v32, -inf }
 0x112   : > { %v815_v35 = vadd.f32 %v814_v33, %v605_v31  ;;  %v512_v36 = vpop.f32.mrf.mxu0  ;;  %v1100_v51 = vsel %vm972_vm7, %v908_v30, %v1036_v46 }
 0x113   : > { %v721_v39 = vpop.f32.mrf.mxu1  ;;  %v2925_v61 = vsel %vm1163_vm1, %v1100_v51, -inf }
 0x114   : > { %v940_v44 = vadd.f32 %v2852_v34, %v815_v35  ;;  %v722_v45 = vadd.f32 %v721_v39, %v512_v36  ;;  %1296 = vmax.xlane.f32.xlu1 %v2909_v40 }
 0x115   : > { %559 = vmatmul.f32.gmra.mxu0 %v423_v37  ;;  %655 = vmatmul.f32.gmra.mxu2 %v455_v38  ;;  %v426_v37 = vld [vmem:[%s2771_s12 + $0xb8] sm:$0xff] }
 0x116   : > { %v909_v47 = vadd.f32 %v2852_v34, %v722_v45  ;;  %vm1004_vm8 = vcmp.ge.f32.partialorder %v940_v44, 0.0  ;;  %v1068_v48 = vmul.f32 0.01, %v940_v44  ;;  %768 = vmatmul.f32.gmra.mxu1 %v343_v42  ;;  %864 = vmatmul.f32.gmra.mxu3 %v375_v43  ;;  %v458_v38 = vld [vmem:[%s2771_s12 + $0x1b8] sm:$0xff] }
 0x117   : > { %v346_v43 = vld [vmem:[%s2763_s9 + $0xb8] sm:$0xff] }
 0x118   : > { %v608_v49 = vpop.f32.mrf.mxu2  ;;  %v1132_v50 = vsel %vm1004_vm8, %v940_v44, %v1068_v48  ;;  %v1037_v53 = vmul.f32 0.01, %v909_v47  ;;  %vm973_vm9 = vcmp.ge.f32.partialorder %v909_v47, 0.0  ;;  %v378_v44 = vld [vmem:[%s2763_s9 + $0x1b8] sm:$0xff] }
 0x119   : > { %v817_v54 = vpop.f32.mrf.mxu3  ;;  %v2918_v55 = vsel %vm1163_vm1, %v1132_v50, -inf }
 0x11a   : > { %v818_v56 = vadd.f32 %v817_v54, %v608_v49  ;;  %1298 = vmax.xlane.f32.xlu2 %v2918_v55  ;;  %v515_v57 = vpop.f32.mrf.mxu0  ;;  %v1101_v3 = vsel %vm973_vm9, %v909_v47, %v1037_v53 }
 0x11b   : > { %v724_v60 = vpop.f32.mrf.mxu1  ;;  %v2934_v7 = vsel %vm1163_vm1, %v1101_v3, -inf }
 0x11c   : > { %v941_v1 = vadd.f32 %v2852_v34, %v818_v56  ;;  %v725_v2 = vadd.f32 %v724_v60, %v515_v57  ;;  %1234 = vmax.xlane.f32.xlu1 %v2925_v61  ;;  %v427_v60 = vld [vmem:[%s2771_s12 + $0xc0] sm:$0xff] }
 0x11d   : > { %658 = vmatmul.f32.gmra.mxu2 %v456_v58  ;;  %562 = vmatmul.f32.gmra.mxu0 %v424_v59  ;;  %v459_v59 = vld [vmem:[%s2771_s12 + $0x1c0] sm:$0xff] }
 0x11e   : > { %v910_v4 = vadd.f32 %v2852_v34, %v725_v2  ;;  %vm1005_vm10 = vcmp.ge.f32.partialorder %v941_v1, 0.0  ;;  %v1069_v5 = vmul.f32 0.01, %v941_v1  ;;  %867 = vmatmul.f32.gmra.mxu3 %v376_v62  ;;  %771 = vmatmul.f32.gmra.mxu1 %v344_v0  ;;  %v347_v2 = vld [vmem:[%s2763_s9 + $0xc0] sm:$0xff] }
 0x120   : > { %v611_v8 = vpop.f32.mrf.mxu2  ;;  %v1133_v9 = vsel %vm1005_vm10, %v941_v1, %v1069_v5  ;;  %v1038_v10 = vmul.f32 0.01, %v910_v4  ;;  %vm974_vm11 = vcmp.ge.f32.partialorder %v910_v4, 0.0  ;;  %v379_v1 = vld [vmem:[%s2763_s9 + $0x1c0] sm:$0xff] }
 0x121   : > { %v820_v11 = vpop.f32.mrf.mxu3  ;;  %v2938_v12 = vsel %vm1163_vm1, %v1133_v9, -inf }
 0x122   : > { %v821_v13 = vadd.f32 %v820_v11, %v611_v8  ;;  %1236 = vmax.xlane.f32.xlu2 %v2934_v7  ;;  %1300 = vmax.xlane.f32.xlu0 %v2938_v12  ;;  %v518_v14 = vpop.f32.mrf.mxu0  ;;  %v1102_v22 = vsel %vm974_vm11, %v910_v4, %v1038_v10 }
 0x123   : > { %v727_v17 = vpop.f32.mrf.mxu1  ;;  %v2950_v27 = vsel %vm1163_vm1, %v1102_v22, -inf }
 0x124   : > { %v942_v20 = vadd.f32 %v2852_v34, %v821_v13  ;;  %v728_v21 = vadd.f32 %v727_v17, %v518_v14 }
 0x125   : > { %565 = vmatmul.f32.gmra.mxu0 %v425_v15  ;;  %661 = vmatmul.f32.gmra.mxu2 %v457_v16 }
 0x126   : > { %v911_v25 = vadd.f32 %v2852_v34, %v728_v21  ;;  %vm1006_vm12 = vcmp.ge.f32.partialorder %v942_v20, 0.0  ;;  %v1070_v26 = vmul.f32 0.01, %v942_v20  ;;  %774 = vmatmul.f32.gmra.mxu1 %v345_v18  ;;  %870 = vmatmul.f32.gmra.mxu3 %v377_v19  ;;  %v428_v18 = vld [vmem:[%s2771_s12 + $0xc8] sm:$0xff] }
 0x127   : > { %v348_v21 = vld [vmem:[%s2763_s9 + $0xc8] sm:$0xff] }
 0x128   : > { %v614_v28 = vpop.f32.mrf.mxu2  ;;  %v1134_v29 = vsel %vm1006_vm12, %v942_v20, %v1070_v26  ;;  %vm975_vm13 = vcmp.ge.f32.partialorder %v911_v25, 0.0  ;;  %v1039_v30 = vmul.f32 0.01, %v911_v25  ;;  %v460_v26 = vld [vmem:[%s2771_s12 + $0x1c8] sm:$0xff] }
 0x129   : > { %v823_v31 = vpop.f32.mrf.mxu3  ;;  %v2954_v32 = vsel %vm1163_vm1, %v1134_v29, -inf }
 0x12a   : > { %v824_v33 = vadd.f32 %v823_v31, %v614_v28  ;;  %1238 = vmax.xlane.f32.xlu2 %v2950_v27  ;;  %1302 = vmax.xlane.f32.xlu1 %v2954_v32  ;;  %v521_v35 = vpop.f32.mrf.mxu0  ;;  %v1103_v36 = vsel %vm975_vm13, %v911_v25, %v1039_v30  ;;  %v380_v28 = vld [vmem:[%s2763_s9 + $0x1c8] sm:$0xff] }
 0x12b   : > { %v730_v39 = vpop.f32.mrf.mxu1  ;;  %v2962_v42 = vsel %vm1163_vm1, %v1103_v36, -inf }
 0x12c   : > { %v943_v45 = vadd.f32 %v2852_v34, %v824_v33  ;;  %v731_v46 = vadd.f32 %v730_v39, %v521_v35  ;;  %1240 = vmax.xlane.f32.xlu0 %v2962_v42 }
 0x12d   : > { %568 = vmatmul.f32.gmra.mxu0 %v426_v37  ;;  %664 = vmatmul.f32.gmra.mxu2 %v458_v38 }
 0x12e   : > { %v912_v47 = vadd.f32 %v2852_v34, %v731_v46  ;;  %vm1007_vm14 = vcmp.ge.f32.partialorder %v943_v45, 0.0  ;;  %v1071_v48 = vmul.f32 0.01, %v943_v45  ;;  %777 = vmatmul.f32.gmra.mxu1 %v346_v43  ;;  %873 = vmatmul.f32.gmra.mxu3 %v378_v44 }
 0x130   : > { %v617_v49 = vpop.f32.mrf.mxu2  ;;  %v1135_v50 = vsel %vm1007_vm14, %v943_v45, %v1071_v48  ;;  %vm976_vm15 = vcmp.ge.f32.partialorder %v912_v47, 0.0  ;;  %v1040_v51 = vmul.f32 0.01, %v912_v47  ;;  %v429_v48 = vld [vmem:[%s2771_s12 + $0xd0] sm:$0xff] }
 0x131   : > { %v826_v53 = vpop.f32.mrf.mxu3  ;;  %v2971_v54 = vsel %vm1163_vm1, %v1135_v50, -inf  ;;  %v349_v50 = vld [vmem:[%s2763_s9 + $0xd0] sm:$0xff] }
 0x132   : > { %v827_v56 = vadd.f32 %v826_v53, %v617_v49  ;;  %1304 = vmax.xlane.f32.xlu2 %v2971_v54  ;;  %v524_v57 = vpop.f32.mrf.mxu0  ;;  %v1104_v58 = vsel %vm976_vm15, %v912_v47, %v1040_v51  ;;  %v461_v49 = vld [vmem:[%s2771_s12 + $0x1d0] sm:$0xff] }
 0x133   : > { %v733_v62 = vpop.f32.mrf.mxu1  ;;  %v2978_v0 = vsel %vm1163_vm1, %v1104_v58, -inf  ;;  %v381_v51 = vld [vmem:[%s2763_s9 + $0x1d0] sm:$0xff] }
 0x134   : > { %v944_v3 = vadd.f32 %v2852_v34, %v827_v56  ;;  %v734_v4 = vadd.f32 %v733_v62, %v524_v57  ;;  %1242 = vmax.xlane.f32.xlu1 %v2978_v0 }
 0x135   : > { %667 = vmatmul.f32.gmra.mxu2 %v459_v59  ;;  %571 = vmatmul.f32.gmra.mxu0 %v427_v60 }
 0x136   : > { %v913_v5 = vadd.f32 %v2852_v34, %v734_v4  ;;  %vm1008_vm0 = vcmp.ge.f32.partialorder %v944_v3, 0.0  ;;  %v1072_v8 = vmul.f32 0.01, %v944_v3  ;;  %876 = vmatmul.f32.gmra.mxu3 %v379_v1  ;;  %780 = vmatmul.f32.gmra.mxu1 %v347_v2 }
 0x138   : > { %v620_v9 = vpop.f32.mrf.mxu2  ;;  %v1136_v10 = vsel %vm1008_vm0, %v944_v3, %v1072_v8  ;;  %vm977_vm2 = vcmp.ge.f32.partialorder %v913_v5, 0.0  ;;  %v1041_v11 = vmul.f32 0.01, %v913_v5 }
 0x139   : > { %v829_v13 = vpop.f32.mrf.mxu3  ;;  %v2987_v14 = vsel %vm1163_vm1, %v1136_v10, -inf }
 0x13a   : > { %v830_v15 = vadd.f32 %v829_v13, %v620_v9  ;;  %1306 = vmax.xlane.f32.xlu0 %v2987_v14  ;;  %v527_v16 = vpop.f32.mrf.mxu0  ;;  %v1105_v17 = vsel %vm977_vm2, %v913_v5, %v1041_v11  ;;  %v462_v13 = vld [vmem:[%s2771_s12 + $0x1d8] sm:$0xff] }
 0x13b   : > { %v736_v19 = vpop.f32.mrf.mxu1  ;;  %v2993_v20 = vsel %vm1163_vm1, %v1105_v17, -inf }
 0x13c   : > { %v945_v22 = vadd.f32 %v2852_v34, %v830_v15  ;;  %v737_v25 = vadd.f32 %v736_v19, %v527_v16  ;;  %1244 = vmax.xlane.f32.xlu2 %v2993_v20  ;;  %v382_v15 = vld [vmem:[%s2763_s9 + $0x1d8] sm:$0xff] }
 0x13d   : > { %574 = vmatmul.f32.gmra.mxu0 %v428_v18  ;;  %670 = vmatmul.f32.gmra.mxu2 %v460_v26 }
 0x13e   : > { %v914_v29 = vadd.f32 %v2852_v34, %v737_v25  ;;  %vm1009_vm3 = vcmp.ge.f32.partialorder %v945_v22, 0.0  ;;  %v1073_v30 = vmul.f32 0.01, %v945_v22  ;;  %783 = vmatmul.f32.gmra.mxu1 %v348_v21  ;;  %879 = vmatmul.f32.gmra.mxu3 %v380_v28  ;;  %v430_v28 = vld [vmem:[%s2771_s12 + $0xd8] sm:$0xff] }
 0x140   : > { %v623_v31 = vpop.f32.mrf.mxu2  ;;  %v1137_v33 = vsel %vm1009_vm3, %v945_v22, %v1073_v30  ;;  %vm978_vm4 = vcmp.ge.f32.partialorder %v914_v29, 0.0  ;;  %v1042_v35 = vmul.f32 0.01, %v914_v29 }
 0x141   : > { %v832_v36 = vpop.f32.mrf.mxu3  ;;  %v3003_v37 = vsel %vm1163_vm1, %v1137_v33, -inf }
 0x142   : > { %v833_v38 = vadd.f32 %v832_v36, %v623_v31  ;;  %1308 = vmax.xlane.f32.xlu1 %v3003_v37  ;;  %v530_v39 = vpop.f32.mrf.mxu0  ;;  %v1106_v43 = vsel %vm978_vm4, %v914_v29, %v1042_v35  ;;  %v350_v29 = vld [vmem:[%s2763_s9 + $0xd8] sm:$0xff] }
 0x143   : > { %v739_v44 = vpop.f32.mrf.mxu1  ;;  %v3008_v45 = vsel %vm1163_vm1, %v1106_v43, -inf }
 0x144   : > { %v946_v46 = vadd.f32 %v2852_v34, %v833_v38  ;;  %v740_v47 = vadd.f32 %v739_v44, %v530_v39  ;;  %1246 = vmax.xlane.f32.xlu0 %v3008_v45 }
 0x145   : > { %577 = vmatmul.f32.gmra.mxu0 %v429_v48  ;;  %673 = vmatmul.f32.gmra.mxu2 %v461_v49 }
 0x146   : > { %v915_v53 = vadd.f32 %v2852_v34, %v740_v47  ;;  %vm1010_vm5 = vcmp.ge.f32.partialorder %v946_v46, 0.0  ;;  %v1074_v56 = vmul.f32 0.01, %v946_v46  ;;  %786 = vmatmul.f32.gmra.mxu1 %v349_v50  ;;  %882 = vmatmul.f32.gmra.mxu3 %v381_v51  ;;  %v431_v51 = vld [vmem:[%s2771_s12 + $0xe0] sm:$0xff] }
 0x148   : > { %v626_v57 = vpop.f32.mrf.mxu2  ;;  %v1138_v58 = vsel %vm1010_vm5, %v946_v46, %v1074_v56  ;;  %vm979_vm6 = vcmp.ge.f32.partialorder %v915_v53, 0.0  ;;  %v1043_v59 = vmul.f32 0.01, %v915_v53 }
 0x149   : > { %v835_v60 = vpop.f32.mrf.mxu3  ;;  %v3019_v62 = vsel %vm1163_vm1, %v1138_v58, -inf }
 0x14a   : > { %v836_v1 = vadd.f32 %v835_v60, %v626_v57  ;;  %1310 = vmax.xlane.f32.xlu2 %v3019_v62  ;;  %v533_v2 = vpop.f32.mrf.mxu0  ;;  %v1107_v3 = vsel %vm979_vm6, %v915_v53, %v1043_v59  ;;  %v351_v53 = vld [vmem:[%s2763_s9 + $0xe0] sm:$0xff] }
 0x14b   : > { %v742_v4 = vpop.f32.mrf.mxu1  ;;  %v3024_v5 = vsel %vm1163_vm1, %v1107_v3, -inf  ;;  %v463_v60 = vld [vmem:[%s2771_s12 + $0x1e0] sm:$0xff] }
 0x14c   : > { %v947_v8 = vadd.f32 %v2852_v34, %v836_v1  ;;  %v743_v9 = vadd.f32 %v742_v4, %v533_v2  ;;  %1248 = vmax.xlane.f32.xlu1 %v3024_v5  ;;  %v383_v1 = vld [vmem:[%s2763_s9 + $0x1e0] sm:$0xff] }
 0x14d   : > { %676 = vmatmul.f32.gmra.mxu2 %v462_v13  ;;  %580 = vmatmul.f32.gmra.mxu0 %v430_v28  ;;  %v352_v28 = vld [vmem:[%s2763_s9 + $0xe8] sm:$0xff] }
 0x14e   : > { %v916_v10 = vadd.f32 %v2852_v34, %v743_v9  ;;  %vm1011_vm7 = vcmp.ge.f32.partialorder %v947_v8, 0.0  ;;  %v1075_v11 = vmul.f32 0.01, %v947_v8  ;;  %885 = vmatmul.f32.gmra.mxu3 %v382_v15  ;;  %789 = vmatmul.f32.gmra.mxu1 %v350_v29 }
 0x150   : > { %v629_v16 = vpop.f32.mrf.mxu2  ;;  %v1139_v17 = vsel %vm1011_vm7, %v947_v8, %v1075_v11  ;;  %vm980_vm8 = vcmp.ge.f32.partialorder %v916_v10, 0.0  ;;  %v1044_v18 = vmul.f32 0.01, %v916_v10 }
 0x151   : > { %v838_v19 = vpop.f32.mrf.mxu3  ;;  %v3033_v21 = vsel %vm1163_vm1, %v1139_v17, -inf }
 0x152   : > { %v839_v22 = vadd.f32 %v838_v19, %v629_v16  ;;  %1312 = vmax.xlane.f32.xlu0 %v3033_v21  ;;  %v536_v25 = vpop.f32.mrf.mxu0  ;;  %v1108_v26 = vsel %vm980_vm8, %v916_v10, %v1044_v18 }
 0x153   : > { %v745_v30 = vpop.f32.mrf.mxu1  ;;  %v3040_v31 = vsel %vm1163_vm1, %v1108_v26, -inf  ;;  %v464_v26 = vld [vmem:[%s2771_s12 + $0x1e8] sm:$0xff] }
 0x154   : > { %v948_v33 = vadd.f32 %v2852_v34, %v839_v22  ;;  %v746_v35 = vadd.f32 %v745_v30, %v536_v25  ;;  %1250 = vmax.xlane.f32.xlu2 %v3040_v31  ;;  %v432_v25 = vld [vmem:[%s2771_s12 + $0xe8] sm:$0xff] }
 0x155   : > { %583 = vmatmul.f32.gmra.mxu0 %v431_v51  ;;  %679 = vmatmul.f32.gmra.mxu2 %v463_v60  ;;  %v465_v60 = vld [vmem:[%s2771_s12 + $0x1f0] sm:$0xff] }
 0x156   : > { %v917_v36 = vadd.f32 %v2852_v34, %v746_v35  ;;  %vm1012_vm9 = vcmp.ge.f32.partialorder %v948_v33, 0.0  ;;  %v1076_v38 = vmul.f32 0.01, %v948_v33  ;;  %792 = vmatmul.f32.gmra.mxu1 %v351_v53  ;;  %888 = vmatmul.f32.gmra.mxu3 %v383_v1  ;;  %v385_v1 = vld [vmem:[%s2763_s9 + $0x1f0] sm:$0xff] }
 0x158   : > { %v632_v39 = vpop.f32.mrf.mxu2  ;;  %v1140_v43 = vsel %vm1012_vm9, %v948_v33, %v1076_v38  ;;  %vm981_vm10 = vcmp.ge.f32.partialorder %v917_v36, 0.0  ;;  %v1045_v44 = vmul.f32 0.01, %v917_v36  ;;  %v384_v33 = vld [vmem:[%s2763_s9 + $0x1e8] sm:$0xff] }
 0x159   : > { %v841_v46 = vpop.f32.mrf.mxu3  ;;  %v3047_v47 = vsel %vm1163_vm1, %v1140_v43, -inf }
 0x15a   : > { %v842_v48 = vadd.f32 %v841_v46, %v632_v39  ;;  %1314 = vmax.xlane.f32.xlu1 %v3047_v47  ;;  %v539_v49 = vpop.f32.mrf.mxu0  ;;  %v1109_v50 = vsel %vm981_vm10, %v917_v36, %v1045_v44 }
 0x15b   : > { %v748_v56 = vpop.f32.mrf.mxu1  ;;  %v3054_v57 = vsel %vm1163_vm1, %v1109_v50, -inf }
 0x15c   : > { %v949_v58 = vadd.f32 %v2852_v34, %v842_v48  ;;  %v749_v59 = vadd.f32 %v748_v56, %v539_v49  ;;  %1252 = vmax.xlane.f32.xlu0 %v3054_v57 }
 0x15d   : > { %586 = vmatmul.f32.gmra.mxu0 %v432_v25  ;;  %682 = vmatmul.f32.gmra.mxu2 %v464_v26  ;;  %v353_v25 = vld [vmem:[%s2763_s9 + $0xf0] sm:$0xff] }
 0x15e   : > { %v918_v2 = vadd.f32 %v2852_v34, %v749_v59  ;;  %vm1013_vm11 = vcmp.ge.f32.partialorder %v949_v58, 0.0  ;;  %v1077_v3 = vmul.f32 0.01, %v949_v58  ;;  %795 = vmatmul.f32.gmra.mxu1 %v352_v28  ;;  %891 = vmatmul.f32.gmra.mxu3 %v384_v33 }
 0x160   : > { %v635_v4 = vpop.f32.mrf.mxu2  ;;  %v1141_v8 = vsel %vm1013_vm11, %v949_v58, %v1077_v3  ;;  %vm982_vm12 = vcmp.ge.f32.partialorder %v918_v2, 0.0  ;;  %v1046_v9 = vmul.f32 0.01, %v918_v2 }
 0x161   : > { %v844_v10 = vpop.f32.mrf.mxu3  ;;  %v3063_v11 = vsel %vm1163_vm1, %v1141_v8, -inf }
 0x162   : > { %v845_v13 = vadd.f32 %v844_v10, %v635_v4  ;;  %1316 = vmax.xlane.f32.xlu2 %v3063_v11  ;;  %v542_v15 = vpop.f32.mrf.mxu0  ;;  %v1110_v16 = vsel %vm982_vm12, %v918_v2, %v1046_v9 }
 0x163   : > { %v751_v17 = vpop.f32.mrf.mxu1  ;;  %v3068_v18 = vsel %vm1163_vm1, %v1110_v16, -inf }
 0x164   : > { %v950_v19 = vadd.f32 %v2852_v34, %v845_v13  ;;  %v752_v22 = vadd.f32 %v751_v17, %v542_v15  ;;  %1254 = vmax.xlane.f32.xlu1 %v3068_v18 }
 0x165   : > { %685 = vmatmul.f32.gmra.mxu2 %v465_v60  ;;  %v354_v60 = vld [vmem:[%s2763_s9 + $0xf8] sm:$0xff] }
 0x166   : > { %v919_v29 = vadd.f32 %v2852_v34, %v752_v22  ;;  %vm1014_vm13 = vcmp.ge.f32.partialorder %v950_v19, 0.0  ;;  %v1078_v30 = vmul.f32 0.01, %v950_v19  ;;  %894 = vmatmul.f32.gmra.mxu3 %v385_v1  ;;  %v433_v22 = vld [vmem:[%s2771_s12 + $0xf0] sm:$0xff]  ;;  %798 = vmatmul.f32.gmra.mxu1 %v353_v25 }
 0x167   : > { %589 = vmatmul.f32.gmra.mxu0 %v433_v22 }
 0x168   : > { %v638_v35 = vpop.f32.mrf.mxu2  ;;  %v1142_v36 = vsel %vm1014_vm13, %v950_v19, %v1078_v30  ;;  %vm983_vm14 = vcmp.ge.f32.partialorder %v919_v29, 0.0  ;;  %v1047_v38 = vmul.f32 0.01, %v919_v29 }
 0x169   : > { %v847_v39 = vpop.f32.mrf.mxu3  ;;  %v3079_v43 = vsel %vm1163_vm1, %v1142_v36, -inf }
 0x16a   : > { %v848_v44 = vadd.f32 %v847_v39, %v638_v35  ;;  %1318 = vmax.xlane.f32.xlu0 %v3079_v43  ;;  %v545_v46 = vpop.f32.mrf.mxu0  ;;  %v1111_v48 = vsel %vm983_vm14, %v919_v29, %v1047_v38 }
 0x16b   : > { %v754_v49 = vpop.f32.mrf.mxu1  ;;  %v3084_v50 = vsel %vm1163_vm1, %v1111_v48, -inf }
 0x16c   : > { %v951_v51 = vadd.f32 %v2852_v34, %v848_v44  ;;  %v755_v53 = vadd.f32 %v754_v49, %v545_v46  ;;  %1256 = vmax.xlane.f32.xlu2 %v3084_v50 }
 0x16e   : > { %v920_v56 = vadd.f32 %v2852_v34, %v755_v53  ;;  %vm1015_vm15 = vcmp.ge.f32.partialorder %v951_v51, 0.0  ;;  %v1079_v58 = vmul.f32 0.01, %v951_v51  ;;  %801 = vmatmul.f32.gmra.mxu1 %v354_v60 }
 0x16f   : > { %v1229_v59 = vpop.xlane.xlu0 %1228 }
 0x170   : > { %v1356_v2 = vsub.f32 %v2866_v52, %v1229_v59  ;;  %v641_v3 = vpop.f32.mrf.mxu2  ;;  %v1143_v4 = vsel %vm1015_vm15, %v951_v51, %v1079_v58  ;;  %vm984_vm0 = vcmp.ge.f32.partialorder %v920_v56, 0.0  ;;  %v1048_v8 = vmul.f32 0.01, %v920_v56  ;;  %v434_v59 = vld [vmem:[%s2771_s12 + $0xf8] sm:$0xff] }
 0x171   : > { %v850_v9 = vpop.f32.mrf.mxu3  ;;  %v3094_v10 = vsel %vm1163_vm1, %v1143_v4, -inf  ;;  %592 = vmatmul.f32.gmra.mxu0 %v434_v59  ;;  %v386_v4 = vld [vmem:[%s2763_s9 + $0x1f8] sm:$0xff]  ;;  %s2530_s9 = scalar_lea.hbm %s3778_s5, 1024 }
 0x172   : > { %v1420_v13 = vmul.f32 1.442695, %v1356_v2  ;;  %v851_v15 = vadd.f32 %v850_v9, %v641_v3  ;;  %1320 = vmax.xlane.f32.xlu1 %v3094_v10  ;;  %v1112_v16 = vsel %vm984_vm0, %v920_v56, %v1048_v8  ;;  %v548_v17 = vpop.f32.mrf.mxu0  ;;  %v466_v3 = vld [vmem:[%s2771_s12 + $0x1f8] sm:$0xff]  ;;  %897 = vmatmul.f32.gmra.mxu3 %v386_v4  ;;  %p2532_p10 = scmp.lt.s32.totalorder %s2530_s9, %s2526_s2 }
 0x173   : > { %v3099_v52 = vsel %vm1163_vm1, %v1112_v16, -inf  ;;  %v757_v19 = vpop.f32.mrf.mxu1  ;;  %688 = vmatmul.f32.gmra.mxu2 %v466_v3 }
 0x174   : > { %2133 = vpow2.f32 %v1420_v13  ;;  %v952_v26 = vadd.f32 %v2852_v34, %v851_v15  ;;  %1258 = vmax.xlane.f32.xlu0 %v3099_v52  ;;  %v758_v28 = vadd.f32 %v757_v19, %v548_v17  ;;  %p2533_p9 = por %p2532_p10, %p2531_p2 }
 0x175   : > { %v1293_v29 = vpop.xlane.xlu2 %1292 }
 0x176   : > { %v1388_v30 = vsub.f32 %v2875_v63, %v1293_v29  ;;  %vm1016_vm2 = vcmp.ge.f32.partialorder %v952_v26, 0.0  ;;  %v1080_v33 = vmul.f32 0.01, %v952_v26  ;;  %v921_v36 = vadd.f32 %v2852_v34, %v758_v28  ;;  %p2534_p11 = pnand %p2533_p9, %p2529_p8 }
 0x177   : > { %v1231_v35 = vpop.xlane.xlu0 %1230 }
 0x178   : > { %v1484_v38 = vmul.f32 1.442695, %v1388_v30  ;;  %v1357_v39 = vsub.f32 %v2882_v6, %v1231_v35  ;;  %v1144_v44 = vsel %vm1016_vm2, %v952_v26, %v1080_v33  ;;  %v644_v46 = vpop.f32.mrf.mxu2  ;;  %v1049_v58 = vmul.f32 0.01, %v921_v36 }
 0x179   : > { %v3110_v48 = vsel %vm1163_vm1, %v1144_v44, -inf  ;;  %v853_v49 = vpop.f32.mrf.mxu3  ;;  %vm985_vm3 = vcmp.ge.f32.partialorder %v921_v36, 0.0 }
 0x17a   : > { %v3112_v51 = vpop.eup %2133  ;;  %2135 = vpow2.f32 %v1484_v38  ;;  %v1422_v63 = vmul.f32 1.442695, %v1357_v39  ;;  %1322 = vmax.xlane.f32.xlu2 %v3110_v48  ;;  %v854_v53 = vadd.f32 %v853_v49, %v644_v46  ;;  %v551_v56 = vpop.f32.mrf.mxu0  ;;  %v1113_v15 = vsel %vm985_vm3, %v921_v36, %v1049_v58 }
 0x17b   : > { %1548 = vadd.xlane.f32.xlu1 %v3112_v51  ;;  %v760_v6 = vpop.f32.mrf.mxu1  ;;  %v3131_v33 = vsel %vm1163_vm1, %v1113_v15, -inf }
 0x17c   : > { %2137 = vpow2.f32 %v1422_v63  ;;  %v953_v1 = vadd.f32 %v2852_v34, %v854_v53  ;;  %v761_v2 = vadd.f32 %v760_v6, %v551_v56 }
 0x17e   : > { %v922_v8 = vadd.f32 %v2852_v34, %v761_v2  ;;  %v1081_v16 = vmul.f32 0.01, %v953_v1  ;;  %vm1017_vm4 = vcmp.ge.f32.partialorder %v953_v1, 0.0 }
 0x17f   : > { %v1233_v9 = vpop.xlane.xlu1 %1232  ;;  %v1295_v13 = vpop.xlane.xlu0 %1294 }
 0x180   : > { %v3122_v17 = vpop.eup %2135  ;;  %v1389_v19 = vsub.f32 %v2897_v24, %v1295_v13  ;;  %v647_v22 = vpop.f32.mrf.mxu2  ;;  %v1050_v26 = vmul.f32 0.01, %v922_v8  ;;  %v1358_v29 = vsub.f32 %v2893_v23, %v1233_v9  ;;  %vm986_vm5 = vcmp.ge.f32.partialorder %v922_v8, 0.0 }
 0x181   : > { %1612 = vadd.xlane.f32.xlu0 %v3122_v17  ;;  %v856_v25 = vpop.f32.mrf.mxu3  ;;  %v1145_v24 = vsel %vm1017_vm4, %v953_v1, %v1081_v16 }
 0x182   : > { %v3126_v28 = vpop.eup %2137  ;;  %v1486_v30 = vmul.f32 1.442695, %v1389_v19  ;;  %v857_v35 = vadd.f32 %v856_v25, %v647_v22  ;;  %v554_v36 = vpop.f32.mrf.mxu0  ;;  %v1114_v39 = vsel %vm986_vm5, %v922_v8, %v1050_v26  ;;  %v1424_v44 = vmul.f32 1.442695, %v1358_v29 }
 0x183   : > { %1260 = vmax.xlane.f32.xlu1 %v3131_v33  ;;  %1550 = vadd.xlane.f32.xlu2 %v3126_v28  ;;  %v763_v38 = vpop.f32.mrf.mxu1  ;;  %v3137_v23 = vsel %vm1163_vm1, %v1145_v24, -inf  ;;  %v3143_v56 = vsel %vm1163_vm1, %v1114_v39, -inf }
 0x184   : > { %2139 = vpow2.f32 %v1486_v30  ;;  %v764_v49 = vadd.f32 %v763_v38, %v554_v36  ;;  %v954_v53 = vadd.f32 %v2852_v34, %v857_v35 }
 0x185   : > { %2141 = vpow2.f32 %v1424_v44 }
 0x186   : > { %v923_v2 = vadd.f32 %v2852_v34, %v764_v49  ;;  %vm1018_vm6 = vcmp.ge.f32.partialorder %v954_v53, 0.0 }
 0x187   : > { %v1297_v46 = vpop.xlane.xlu1 %1296 }
 0x188   : > { %v1390_v63 = vsub.f32 %v2909_v40, %v1297_v46  ;;  %v650_v6 = vpop.f32.mrf.mxu2  ;;  %v1082_v40 = vmul.f32 0.01, %v954_v53  ;;  %v1051_v15 = vmul.f32 0.01, %v923_v2  ;;  %vm987_vm7 = vcmp.ge.f32.partialorder %v923_v2, 0.0 }
 0x189   : > { %1324 = vmax.xlane.f32.xlu0 %v3137_v23  ;;  %v859_v58 = vpop.f32.mrf.mxu3 }
 0x18a   : > { %v1488_v59 = vmul.f32 1.442695, %v1390_v63  ;;  %v860_v60 = vadd.f32 %v859_v58, %v650_v6  ;;  %v3146_v1 = vpop.eup %2139  ;;  %v557_v8 = vpop.f32.mrf.mxu0  ;;  %v1146_v22 = vsel %vm1018_vm6, %v954_v53, %v1082_v40  ;;  %v1115_v24 = vsel %vm987_vm7, %v923_v2, %v1051_v15  ;;  %v3173_v58 = vld [vmem:[%s3777_s4] ss:$0 sm:$0xff] }
 0x18b   : > { %1262 = vmax.xlane.f32.xlu2 %v3143_v56  ;;  %1614 = vadd.xlane.f32.xlu1 %v3146_v1  ;;  %v766_v9 = vpop.f32.mrf.mxu1  ;;  %v3152_v16 = vpop.eup %2141  ;;  %v3168_v46 = vsel %vm1163_vm1, %v1115_v24, -inf }
 0x18c   : > { %2143 = vpow2.f32 %v1488_v59  ;;  %v955_v4 = vadd.f32 %v2852_v34, %v860_v60  ;;  %v3162_v34 = vsel %vm1163_vm1, %v1146_v22, -inf }
 0x18d   : > { %v1299_v3 = vpop.xlane.xlu2 %1298 }
 0x18e   : > { %v1083_v25 = vmul.f32 0.01, %v955_v4  ;;  %v1391_v29 = vsub.f32 %v2918_v55, %v1299_v3  ;;  %vm1019_vm8 = vcmp.ge.f32.partialorder %v955_v4, 0.0 }
 0x18f   : > { %v1235_v13 = vpop.xlane.xlu1 %1234 }
 0x190   : > { %v1359_v19 = vsub.f32 %v2925_v61, %v1235_v13  ;;  %v767_v61 = vadd.f32 %v766_v9, %v557_v8  ;;  %v653_v35 = vpop.f32.mrf.mxu2  ;;  %v1147_v39 = vsel %vm1019_vm8, %v955_v4, %v1083_v25  ;;  %v1490_v44 = vmul.f32 1.442695, %v1391_v29 }
 0x191   : > { %1552 = vadd.xlane.f32.xlu0 %v3152_v16  ;;  %v862_v36 = vpop.f32.mrf.mxu3  ;;  %v3178_v60 = vsel %vm1163_vm1, %v1147_v39, -inf }
 0x192   : > { %v3156_v26 = vpop.eup %2143  ;;  %v1426_v30 = vmul.f32 1.442695, %v1359_v19  ;;  %v560_v49 = vpop.f32.mrf.mxu0  ;;  %v863_v53 = vadd.f32 %v862_v36, %v653_v35  ;;  %v924_v59 = vadd.f32 %v3173_v58, %v767_v61 }
 0x193   : > { %1616 = vadd.xlane.f32.xlu2 %v3156_v26  ;;  %1326 = vmax.xlane.f32.xlu1 %v3162_v34  ;;  %v769_v63 = vpop.f32.mrf.mxu1 }
 0x194   : > { %2145 = vpow2.f32 %v1426_v30  ;;  %v956_v3 = vadd.f32 %v3173_v58, %v863_v53  ;;  %v1052_v4 = vmul.f32 0.01, %v924_v59  ;;  %vm988_vm9 = vcmp.ge.f32.partialorder %v924_v59, 0.0 }
 0x195   : > { %v1237_v38 = vpop.xlane.xlu2 %1236  ;;  %2147 = vpow2.f32 %v1490_v44  ;;  %v1301_v40 = vpop.xlane.xlu0 %1300 }
 0x196   : > { %v1360_v55 = vsub.f32 %v2934_v7, %v1237_v38  ;;  %v770_v7 = vadd.f32 %v769_v63, %v560_v49  ;;  %v1392_v8 = vsub.f32 %v2938_v12, %v1301_v40  ;;  %v1084_v22 = vmul.f32 0.01, %v956_v3 }
 0x197   : > { %v1116_v29 = vsel %vm988_vm9, %v924_v59, %v1052_v4  ;;  %vm1020_vm10 = vcmp.ge.f32.partialorder %v956_v3, 0.0 }
 0x198   : > { %v1428_v6 = vmul.f32 1.442695, %v1360_v55  ;;  %v925_v9 = vadd.f32 %v3173_v58, %v770_v7  ;;  %v656_v13 = vpop.f32.mrf.mxu2  ;;  %v1492_v30 = vmul.f32 1.442695, %v1392_v8  ;;  %v3197_v36 = vsel %vm1163_vm1, %v1116_v29, -inf }
 0x199   : > { %1264 = vmax.xlane.f32.xlu0 %v3168_v46  ;;  %v865_v15 = vpop.f32.mrf.mxu3  ;;  %v1148_v38 = vsel %vm1020_vm10, %v956_v3, %v1084_v22 }
 0x19a   : > { %v3181_v2 = vpop.eup %2145  ;;  %2149 = vpow2.f32 %v1428_v6  ;;  %v1053_v61 = vmul.f32 0.01, %v925_v9  ;;  %vm989_vm11 = vcmp.ge.f32.partialorder %v925_v9, 0.0  ;;  %v866_v44 = vadd.f32 %v865_v15, %v656_v13  ;;  %v563_v55 = vpop.f32.mrf.mxu0 }
 0x19b   : > { %1328 = vmax.xlane.f32.xlu2 %v3178_v60  ;;  %1554 = vadd.xlane.f32.xlu1 %v3181_v2  ;;  %v3188_v25 = vpop.eup %2147  ;;  %v772_v49 = vpop.f32.mrf.mxu1  ;;  %2151 = vpow2.f32 %v1492_v30 }
 0x19c   : > { %v1117_v63 = vsel %vm989_vm11, %v925_v9, %v1053_v61  ;;  %v773_v7 = vadd.f32 %v772_v49, %v563_v55  ;;  %v957_v3 = vadd.f32 %v3173_v58, %v866_v44 }
 0x19d   : > { %v1239_v19 = vpop.xlane.xlu2 %1238  ;;  %v1303_v24 = vpop.xlane.xlu1 %1302 }
 0x19e   : > { %v1361_v12 = vsub.f32 %v2950_v27, %v1239_v19  ;;  %v1393_v39 = vsub.f32 %v2954_v32, %v1303_v24  ;;  %v3203_v27 = vsel %vm1163_vm1, %v1148_v38, -inf  ;;  %v3208_v32 = vsel %vm1163_vm1, %v1117_v63, -inf }
 0x19f   : > { %v1241_v8 = vpop.xlane.xlu0 %1240  ;;  %v926_v13 = vadd.f32 %v3173_v58, %v773_v7  ;;  %v1085_v15 = vmul.f32 0.01, %v957_v3  ;;  %vm1021_vm12 = vcmp.ge.f32.partialorder %v957_v3, 0.0 }
 0x1a0   : > { %v3191_v35 = vpop.eup %2149  ;;  %v1430_v53 = vmul.f32 1.442695, %v1361_v12  ;;  %v659_v6 = vpop.f32.mrf.mxu2  ;;  %v1494_v40 = vmul.f32 1.442695, %v1393_v39  ;;  %v1362_v19 = vsub.f32 %v2962_v42, %v1241_v8 }
 0x1a1   : > { %1618 = vadd.xlane.f32.xlu0 %v3188_v25  ;;  %v868_v59 = vpop.f32.mrf.mxu3  ;;  %v3211_v9 = vpop.eup %2151  ;;  %v1054_v61 = vmul.f32 0.01, %v926_v13  ;;  %v1149_v38 = vsel %vm1021_vm12, %v957_v3, %v1085_v15  ;;  %vm990_vm13 = vcmp.ge.f32.partialorder %v926_v13, 0.0 }
 0x1a2   : > { %v869_v4 = vadd.f32 %v868_v59, %v659_v6  ;;  %2153 = vpow2.f32 %v1430_v53  ;;  %v566_v29 = vpop.f32.mrf.mxu0  ;;  %v1432_v39 = vmul.f32 1.442695, %v1362_v19  ;;  %v3227_v63 = vsel %vm1163_vm1, %v1149_v38, -inf }
 0x1a3   : > { %1556 = vadd.xlane.f32.xlu2 %v3191_v35  ;;  %1266 = vmax.xlane.f32.xlu1 %v3197_v36  ;;  %2155 = vpow2.f32 %v1494_v40  ;;  %v775_v30 = vpop.f32.mrf.mxu1  ;;  %v1118_v53 = vsel %vm990_vm13, %v926_v13, %v1054_v61 }
 0x1a4   : > { %v958_v22 = vadd.f32 %v3173_v58, %v869_v4  ;;  %v776_v59 = vadd.f32 %v775_v30, %v566_v29  ;;  %2157 = vpow2.f32 %v1432_v39 }
 0x1a5   : > { %v1305_v24 = vpop.xlane.xlu2 %1304 }
 0x1a6   : > { %v1086_v55 = vmul.f32 0.01, %v958_v22  ;;  %v1394_v42 = vsub.f32 %v2971_v54, %v1305_v24  ;;  %vm1022_vm14 = vcmp.ge.f32.partialorder %v958_v22, 0.0  ;;  %v3233_v54 = vsel %vm1163_vm1, %v1118_v53, -inf }
 0x1a7   : > { %v1243_v44 = vpop.xlane.xlu1 %1242  ;;  %v927_v13 = vadd.f32 %v3173_v58, %v776_v59 }
 0x1a8   : > { %v3218_v12 = vpop.eup %2153  ;;  %v1363_v6 = vsub.f32 %v2978_v0, %v1243_v44  ;;  %v662_v7 = vpop.f32.mrf.mxu2  ;;  %v1150_v3 = vsel %vm1022_vm14, %v958_v22, %v1086_v55  ;;  %v1496_v4 = vmul.f32 1.442695, %v1394_v42 }
 0x1a9   : > { %1330 = vmax.xlane.f32.xlu0 %v3203_v27  ;;  %v3221_v49 = vpop.eup %2155  ;;  %v871_v40 = vpop.f32.mrf.mxu3  ;;  %v3238_v0 = vsel %vm1163_vm1, %v1150_v3, -inf  ;;  %v1055_v38 = vmul.f32 0.01, %v927_v13  ;;  %vm991_vm15 = vcmp.ge.f32.partialorder %v927_v13, 0.0 }
 0x1aa   : > { %v569_v8 = vpop.f32.mrf.mxu0  ;;  %v872_v19 = vadd.f32 %v871_v40, %v662_v7  ;;  %v1434_v24 = vmul.f32 1.442695, %v1363_v6  ;;  %2159 = vpow2.f32 %v1496_v4  ;;  %v3241_v30 = vpop.eup %2157 }
 0x1ab   : > { %1268 = vmax.xlane.f32.xlu2 %v3208_v32  ;;  %1620 = vadd.xlane.f32.xlu1 %v3211_v9  ;;  %v778_v15 = vpop.f32.mrf.mxu1  ;;  %v1119_v7 = vsel %vm991_vm15, %v927_v13, %v1055_v38 }
 0x1ac   : > { %v779_v29 = vadd.f32 %v778_v15, %v569_v8  ;;  %v959_v61 = vadd.f32 %v3173_v58, %v872_v19  ;;  %2161 = vpow2.f32 %v1434_v24  ;;  %v3257_v15 = vsel %vm1163_vm1, %v1119_v7, -inf }
 0x1ad   : > { %v1307_v22 = vpop.xlane.xlu0 %1306 }
 0x1ae   : > { %v1395_v39 = vsub.f32 %v2987_v14, %v1307_v22  ;;  %v928_v44 = vadd.f32 %v3173_v58, %v779_v29  ;;  %v1087_v6 = vmul.f32 0.01, %v959_v61  ;;  %vm1023_vm0 = vcmp.ge.f32.partialorder %v959_v61, 0.0 }
 0x1af   : > { %v1245_v53 = vpop.xlane.xlu2 %1244 }
 0x1b0   : > { %v665_v55 = vpop.f32.mrf.mxu2  ;;  %v3248_v59 = vpop.eup %2159  ;;  %v1498_v40 = vmul.f32 1.442695, %v1395_v39  ;;  %v1056_v4 = vmul.f32 0.01, %v928_v44  ;;  %v1364_v14 = vsub.f32 %v2993_v20, %v1245_v53  ;;  %vm992_vm2 = vcmp.ge.f32.partialorder %v928_v44, 0.0 }
 0x1b1   : > { %1558 = vadd.xlane.f32.xlu0 %v3218_v12  ;;  %v874_v42 = vpop.f32.mrf.mxu3  ;;  %3813 = vst [vmem:[#allocation17_spill] sm:$0xff] %v3248_v59  ;;  %v1151_v19 = vsel %vm1023_vm0, %v959_v61, %v1087_v6 }
 0x1b2   : > { %v3251_v8 = vpop.eup %2161  ;;  %v875_v13 = vadd.f32 %v874_v42, %v665_v55  ;;  %v572_v29 = vpop.f32.mrf.mxu0  ;;  %2163 = vpow2.f32 %v1498_v40  ;;  %v1120_v38 = vsel %vm992_vm2, %v928_v44, %v1056_v4  ;;  %v1436_v39 = vmul.f32 1.442695, %v1364_v14 }
 0x1b3   : > { %1622 = vadd.xlane.f32.xlu2 %v3221_v49  ;;  %1332 = vmax.xlane.f32.xlu1 %v3227_v63  ;;  %3814 = vst [vmem:[#allocation18_spill] sm:$0xff] %v3251_v8  ;;  %v781_v22 = vpop.f32.mrf.mxu1  ;;  %v3263_v20 = vsel %vm1163_vm1, %v1151_v19, -inf }
 0x1b4   : > { %v960_v61 = vadd.f32 %v3173_v58, %v875_v13  ;;  %2165 = vpow2.f32 %v1436_v39 }
 0x1b5   : > { %v1309_v3 = vpop.xlane.xlu1 %1308 }
 0x1b6   : > { %v1396_v24 = vsub.f32 %v3003_v37, %v1309_v3  ;;  %v3268_v37 = vsel %vm1163_vm1, %v1120_v38, -inf  ;;  %v1088_v40 = vmul.f32 0.01, %v960_v61  ;;  %vm1024_vm3 = vcmp.ge.f32.partialorder %v960_v61, 0.0 }
 0x1b7   : > { %3815 = vst [vmem:[#allocation19_spill] sm:$0xff] %v3268_v37  ;;  %v1247_v44 = vpop.xlane.xlu0 %1246 }
 0x1b8   : > { %v668_v53 = vpop.f32.mrf.mxu2  ;;  %v1500_v7 = vmul.f32 1.442695, %v1396_v24  ;;  %v3271_v42 = vpop.eup %2163  ;;  %v1365_v3 = vsub.f32 %v3008_v45, %v1247_v44 }
 0x1b9   : > { %1270 = vmax.xlane.f32.xlu0 %v3233_v54  ;;  %3816 = vst [vmem:[#allocation20_spill] sm:$0xff] %v3271_v42 }
 0x1ba   : > { %2167 = vpow2.f32 %v1500_v7  ;;  %v1438_v38 = vmul.f32 1.442695, %v1365_v3 }
 0x1bb   : > { %1334 = vmax.xlane.f32.xlu2 %v3238_v0  ;;  %1560 = vadd.xlane.f32.xlu1 %v3241_v30  ;;  %v784_v24 = vpop.f32.mrf.mxu1 }
 0x1bc   : > { %2169 = vpow2.f32 %v1438_v38 }
 0x1bd   : > { %v1311_v4 = vpop.xlane.xlu2 %1310 }
 0x1be   : > { %v1397_v45 = vsub.f32 %v3019_v62, %v1311_v4 }
 0x1bf   : > { %v1249_v14 = vpop.xlane.xlu1 %1248 }
 0x1c0   : > { %v1502_v4 = vmul.f32 1.442695, %v1397_v45 }
 0x1c1   : > { %1624 = vadd.xlane.f32.xlu0 %v3248_v59  ;;  %v782_v59 = vadd.f32 %v781_v22, %v572_v29  ;;  %v3278_v29 = vpop.eup %2165  ;;  %v1152_v22 = vsel %vm1024_vm3, %v960_v61, %v1088_v40  ;;  %v1366_v61 = vsub.f32 %v3024_v5, %v1249_v14 }
 0x1c2   : > { %3817 = vst [vmem:[#allocation21_spill] sm:$0xff] %v3278_v29  ;;  %v3281_v39 = vpop.eup %2167  ;;  %2171 = vpow2.f32 %v1502_v4 }
 0x1c3   : > { %1562 = vadd.xlane.f32.xlu2 %v3251_v8  ;;  %1272 = vmax.xlane.f32.xlu1 %v3257_v15  ;;  %v877_v8 = vpop.f32.mrf.mxu3  ;;  %v929_v6 = vadd.f32 %v3173_v58, %v782_v59  ;;  %3818 = vst [vmem:[#allocation22_spill] sm:$0xff] %v3281_v39 }
 0x1c4   : > { %v878_v55 = vadd.f32 %v877_v8, %v668_v53  ;;  %v575_v8 = vpop.f32.mrf.mxu0  ;;  %v3287_v53 = vsel %vm1163_vm1, %v1152_v22, -inf }
 0x1c5   : > { %v1057_v13 = vmul.f32 0.01, %v929_v6  ;;  %vm993_vm4 = vcmp.ge.f32.partialorder %v929_v6, 0.0  ;;  %v1313_v44 = vpop.xlane.xlu0 %1312  ;;  %v785_v40 = vadd.f32 %v784_v24, %v575_v8 }
 0x1c6   : > { %v961_v19 = vadd.f32 %v3173_v58, %v878_v55  ;;  %v671_v55 = vpop.f32.mrf.mxu2  ;;  %v1398_v45 = vsub.f32 %v3033_v21, %v1313_v44 }
 0x1c7   : > { %v1121_v7 = vsel %vm993_vm4, %v929_v6, %v1057_v13  ;;  %v1440_v13 = vmul.f32 1.442695, %v1366_v61  ;;  %v930_v5 = vadd.f32 %v3173_v58, %v785_v40 }
 0x1c8   : > { %v1089_v59 = vmul.f32 0.01, %v961_v19  ;;  %vm1025_vm5 = vcmp.ge.f32.partialorder %v961_v19, 0.0 }
 0x1c9   : > { %1336 = vmax.xlane.f32.xlu0 %v3263_v20  ;;  %2173 = vpow2.f32 %v1440_v13  ;;  %vm994_vm6 = vcmp.ge.f32.partialorder %v930_v5, 0.0 }
 0x1ca   : > { %v1153_v62 = vsel %vm1025_vm5, %v961_v19, %v1089_v59  ;;  %v3301_v19 = vpop.eup %2169  ;;  %v1058_v59 = vmul.f32 0.01, %v930_v5 }
 0x1cb   : > { %1274 = vmax.xlane.f32.xlu2 %v3268_v37  ;;  %1626 = vadd.xlane.f32.xlu1 %v3271_v42  ;;  %v880_v3 = vpop.f32.mrf.mxu3  ;;  %v787_v37 = vpop.f32.mrf.mxu1  ;;  %v3298_v14 = vsel %vm1163_vm1, %v1153_v62, -inf  ;;  %3821 = vst [vmem:[#allocation25_spill] sm:$0xff] %v3301_v19 }
 0x1cc   : > { %v578_v22 = vpop.f32.mrf.mxu0  ;;  %v881_v6 = vadd.f32 %v880_v3, %v671_v55  ;;  %3820 = vst [vmem:[#allocation24_spill] sm:$0xff] %v3298_v14  ;;  %v3312_v62 = vpop.eup %2171  ;;  %v1122_v4 = vsel %vm994_vm6, %v930_v5, %v1058_v59 }
 0x1cd   : > { %v1315_v42 = vpop.xlane.xlu1 %1314  ;;  %v788_v8 = vadd.f32 %v787_v37, %v578_v22  ;;  %3822 = vst [vmem:[#allocation26_spill] sm:$0xff] %v3312_v62  ;;  %v1504_v22 = vmul.f32 1.442695, %v1398_v45 }
 0x1ce   : > { %v962_v24 = vadd.f32 %v3173_v58, %v881_v6  ;;  %v674_v61 = vpop.f32.mrf.mxu2  ;;  %v1399_v5 = vsub.f32 %v3047_v47, %v1315_v42 }
 0x1cf   : > { %v1253_v38 = vpop.xlane.xlu0 %1252  ;;  %v931_v37 = vadd.f32 %v3173_v58, %v788_v8  ;;  %v3315_v13 = vpop.eup %2173  ;;  %v3321_v8 = vsel %vm1163_vm1, %v1122_v4, -inf  ;;  %2175 = vpow2.f32 %v1504_v22 }
 0x1d0   : > { %v1090_v3 = vmul.f32 0.01, %v962_v24  ;;  %vm1026_vm7 = vcmp.ge.f32.partialorder %v962_v24, 0.0  ;;  %3823 = vst [vmem:[#allocation27_spill] sm:$0xff] %v3315_v13  ;;  %v1506_v47 = vmul.f32 1.442695, %v1399_v5 }
 0x1d1   : > { %1564 = vadd.xlane.f32.xlu0 %v3278_v29  ;;  %v1251_v29 = vpop.xlane.xlu2 %1250  ;;  %v1059_v6 = vmul.f32 0.01, %v931_v37  ;;  %vm995_vm8 = vcmp.ge.f32.partialorder %v931_v37, 0.0 }
 0x1d2   : > { %v1367_v21 = vsub.f32 %v3040_v31, %v1251_v29 }
 0x1d3   : > { %1628 = vadd.xlane.f32.xlu2 %v3281_v39  ;;  %1338 = vmax.xlane.f32.xlu1 %v3287_v53  ;;  %v3293_v39 = vsel %vm1163_vm1, %v1121_v7, -inf  ;;  %v883_v40 = vpop.f32.mrf.mxu3  ;;  %v1123_v29 = vsel %vm995_vm8, %v931_v37, %v1059_v6 }
 0x1d4   : > { %3819 = vst [vmem:[#allocation23_spill] sm:$0xff] %v3293_v39  ;;  %v581_v44 = vpop.f32.mrf.mxu0  ;;  %v884_v45 = vadd.f32 %v883_v40, %v674_v61  ;;  %v3338_v61 = vsel %vm1163_vm1, %v1123_v29, -inf }
 0x1d5   : > { %3825 = vst [vmem:[#allocation29_spill] sm:$0xff] %v3338_v61  ;;  %v3341_v37 = vpop.eup %2175 }
 0x1d6   : > { %v963_v42 = vadd.f32 %v3173_v58, %v884_v45  ;;  %3826 = vst [vmem:[#allocation30_spill] sm:$0xff] %v3341_v37 }
 0x1d7   : > { %v3309_v55 = vpop.xlane.xlu1 %1254 }
 0x1d8   : > { %v1091_v6 = vmul.f32 0.01, %v963_v42  ;;  %vm1027_vm9 = vcmp.ge.f32.partialorder %v963_v42, 0.0 }
 0x1d9   : > { %1276 = vmax.xlane.f32.xlu0 %v3293_v39  ;;  %v3307_v7 = vpop.xlane.xlu2 %1316 }
 0x1db   : > { %1340 = vmax.xlane.f32.xlu2 %v3298_v14  ;;  %1566 = vadd.xlane.f32.xlu1 %v3301_v19  ;;  %v1154_v19 = vsel %vm1026_vm7, %v962_v24, %v1090_v3  ;;  %v790_v14 = vpop.f32.mrf.mxu1  ;;  %v677_v24 = vpop.f32.mrf.mxu2 }
 0x1dc   : > { %v3333_v4 = vsel %vm1163_vm1, %v1154_v19, -inf  ;;  %v886_v3 = vpop.f32.mrf.mxu3  ;;  %v791_v39 = vadd.f32 %v790_v14, %v581_v44  ;;  %v1368_v14 = vsub.f32 %v3054_v57, %v1253_v38 }
 0x1dd   : > { %v3324_v59 = vpop.xlane.xlu0 %1318  ;;  %3824 = vst [vmem:[#allocation28_spill] sm:$0xff] %v3333_v4  ;;  %v887_v40 = vadd.f32 %v886_v3, %v677_v24  ;;  %v1155_v3 = vsel %vm1027_vm9, %v963_v42, %v1091_v6  ;;  %v1369_v42 = vsub.f32 %v3068_v18, %v3309_v55 }
 0x1de   : > { %v932_v19 = vadd.f32 %v3173_v58, %v791_v39  ;;  %v1444_v39 = vmul.f32 1.442695, %v1368_v14 }
 0x1df   : > { %v964_v5 = vadd.f32 %v3173_v58, %v887_v40  ;;  %v3362_v40 = vsel %vm1163_vm1, %v1155_v3, -inf }
 0x1e0   : > { %v1060_v29 = vmul.f32 0.01, %v932_v19  ;;  %vm996_vm10 = vcmp.ge.f32.partialorder %v932_v19, 0.0 }
 0x1e1   : > { %1630 = vadd.xlane.f32.xlu0 %v3312_v62  ;;  %v3327_v62 = vpop.xlane.xlu2 %1256  ;;  %v1092_v57 = vmul.f32 0.01, %v964_v5  ;;  %vm1028_vm11 = vcmp.ge.f32.partialorder %v964_v5, 0.0 }
 0x1e3   : > { %1568 = vadd.xlane.f32.xlu2 %v3315_v13  ;;  %1278 = vmax.xlane.f32.xlu1 %v3321_v8  ;;  %v1442_v13 = vmul.f32 1.442695, %v1367_v21  ;;  %v584_v21 = vpop.f32.mrf.mxu0 }
 0x1e5   : > { %v3329_v31 = vpop.xlane.xlu1 %1320  ;;  %2177 = vpow2.f32 %v1442_v13  ;;  %v793_v13 = vpop.f32.mrf.mxu1 }
 0x1e6   : > { %2179 = vpow2.f32 %v1506_v47  ;;  %v1400_v47 = vsub.f32 %v3063_v11, %v3307_v7  ;;  %v794_v6 = vadd.f32 %v793_v13, %v584_v21  ;;  %v1156_v7 = vsel %vm1028_vm11, %v964_v5, %v1092_v57 }
 0x1e7   : > { %v3346_v22 = vpop.xlane.xlu0 %1258  ;;  %v3381_v5 = vsel %vm1163_vm1, %v1156_v7, -inf }
 0x1e8   : > { %v933_v21 = vadd.f32 %v3173_v58, %v794_v6 }
 0x1e9   : > { %1342 = vmax.xlane.f32.xlu0 %v3333_v4  ;;  %v1508_v4 = vmul.f32 1.442695, %v1400_v47 }
 0x1ea   : > { %vm997_vm12 = vcmp.ge.f32.partialorder %v933_v21, 0.0 }
 0x1eb   : > { %1280 = vmax.xlane.f32.xlu2 %v3338_v61  ;;  %1632 = vadd.xlane.f32.xlu1 %v3341_v37  ;;  %v3352_v24 = vpop.eup %2177  ;;  %v680_v37 = vpop.f32.mrf.mxu2 }
 0x1ec   : > { %3827 = vst [vmem:[#allocation31_spill] sm:$0xff] %v3352_v24  ;;  %v3355_v38 = vpop.eup %2179 }
 0x1ed   : > { %v3349_v44 = vpop.xlane.xlu2 %1322  ;;  %3828 = vst [vmem:[#allocation32_spill] sm:$0xff] %v3355_v38  ;;  %v796_v61 = vpop.f32.mrf.mxu1 }
 0x1ee   : > { %v1549_v45 = vpop.xlane.xlu1 %1548 }
 0x1ef   : > { %2181 = vrcp.f32 %v1549_v45  ;;  %v1124_v45 = vsel %vm996_vm10, %v932_v19, %v1060_v29 }
 0x1f0   : > { %2183 = vpow2.f32 %v1444_v39  ;;  %v3372_v18 = vsel %vm1163_vm1, %v1124_v45, -inf  ;;  %v1446_v39 = vmul.f32 1.442695, %v1369_v42 }
 0x1f1   : > { %1570 = vadd.xlane.f32.xlu0 %v3352_v24  ;;  %v889_v24 = vpop.f32.mrf.mxu3 }
 0x1f2   : > { %v890_v55 = vadd.f32 %v889_v24, %v680_v37  ;;  %v1401_v24 = vsub.f32 %v3079_v43, %v3324_v59 }
 0x1f3   : > { %1634 = vadd.xlane.f32.xlu2 %v3355_v38  ;;  %1344 = vmax.xlane.f32.xlu1 %v3362_v40  ;;  %v587_v38 = vpop.f32.mrf.mxu0  ;;  %v683_v42 = vpop.f32.mrf.mxu2 }
 0x1f4   : > { %v1613_v14 = vpop.xlane.xlu0 %1612  ;;  %v965_v37 = vadd.f32 %v3173_v58, %v890_v55  ;;  %v1510_v7 = vmul.f32 1.442695, %v1401_v24 }
 0x1f5   : > { %v2182_v11 = vpop.eup %2181  ;;  %2185 = vrcp.f32 %v1613_v14 }
 0x1f6   : > { %v1740_v3 = vmul.f32 %v2182_v11, %v3112_v51  ;;  %v3368_v19 = vpop.xlane.xlu1 %1260  ;;  %v1551_v29 = vpop.xlane.xlu2 %1550  ;;  %v797_v51 = vadd.f32 %v796_v61, %v587_v38  ;;  %v1061_v61 = vmul.f32 0.01, %v933_v21  ;;  %v1093_v59 = vmul.f32 0.01, %v965_v37 }
 0x1f7   : > { %2187 = vrcp.f32 %v1551_v29  ;;  %v3384_v13 = vpop.eup %2183  ;;  %vm1029_vm13 = vcmp.ge.f32.partialorder %v965_v37, 0.0 }
 0x1f8   : > { %1804 = vst [vmem:[%s3375_s28] sm:$0xff] %v1740_v3  ;;  %2189 = vpow2.f32 %v1508_v4  ;;  %v934_v4 = vadd.f32 %v3173_v58, %v797_v51  ;;  %v1125_v3 = vsel %vm997_vm12, %v933_v21, %v1061_v61  ;;  %v1157_v51 = vsel %vm1029_vm13, %v965_v37, %v1093_v59  ;;  %v799_v61 = vpop.f32.mrf.mxu1 }
 0x1f9   : > { %1282 = vmax.xlane.f32.xlu0 %v3372_v18  ;;  %2191 = vpow2.f32 %v1446_v39  ;;  %v892_v11 = vpop.f32.mrf.mxu3  ;;  %v3410_v39 = vsel %vm1163_vm1, %v1125_v3, -inf  ;;  %v1402_v21 = vsub.f32 %v3094_v10, %v3329_v31  ;;  %v3417_v37 = vsel %vm1163_vm1, %v1157_v51, -inf }
 0x1fa   : > { %v1062_v29 = vmul.f32 0.01, %v934_v4  ;;  %vm998_vm14 = vcmp.ge.f32.partialorder %v934_v4, 0.0  ;;  %v1371_v51 = vsub.f32 %v3099_v52, %v3346_v22 }
 0x1fb   : > { %v2186_v57 = vpop.eup %2185  ;;  %1346 = vmax.xlane.f32.xlu2 %v3381_v5  ;;  %1572 = vadd.xlane.f32.xlu1 %v3384_v13 }
 0x1fc   : > { %v1772_v47 = vmul.f32 %v2186_v57, %v3122_v17  ;;  %v3392_v45 = vpop.xlane.xlu0 %1324  ;;  %v590_v57 = vpop.f32.mrf.mxu0  ;;  %v1450_v52 = vmul.f32 1.442695, %v1371_v51 }
 0x1fd   : > { %v2188_v38 = vpop.eup %2187  ;;  %v800_v31 = vadd.f32 %v799_v61, %v590_v57 }
 0x1fe   : > { %1836 = vst [vmem:[%s3375_s28 + $0x100] sm:$0xff] %v1772_v47  ;;  %v1741_v14 = vmul.f32 %v2188_v38, %v3126_v28  ;;  %v3397_v6 = vpop.xlane.xlu2 %1262  ;;  %v1615_v43 = vpop.xlane.xlu1 %1614  ;;  %v1370_v28 = vsub.f32 %v3084_v50, %v3327_v62  ;;  %v893_v47 = vadd.f32 %v892_v11, %v683_v42  ;;  %v1126_v50 = vsel %vm998_vm14, %v934_v4, %v1062_v29 }
 0x1ff   : > { %v3399_v17 = vpop.eup %2189  ;;  %2193 = vrcp.f32 %v1615_v43  ;;  %v686_v62 = vpop.f32.mrf.mxu2  ;;  %v1512_v42 = vmul.f32 1.442695, %v1402_v21  ;;  %v3425_v4 = vsel %vm1163_vm1, %v1126_v50, -inf }
 0x200   : > { %1805 = vst [vmem:[%s3375_s28 + $0x8] sm:$0xff] %v1741_v14  ;;  %v3403_v55 = vpop.eup %2191  ;;  %2195 = vpow2.f32 %v1510_v7  ;;  %v1448_v14 = vmul.f32 1.442695, %v1370_v28  ;;  %v966_v11 = vadd.f32 %v3173_v58, %v893_v47  ;;  %v935_v28 = vadd.f32 %v3173_v58, %v800_v31 }
 0x201   : > { %1636 = vadd.xlane.f32.xlu0 %v3399_v17  ;;  %v895_v59 = vpop.f32.mrf.mxu3 }
 0x202   : > { %v896_v3 = vadd.f32 %v895_v59, %v686_v62  ;;  %vm1030_vm15 = vcmp.ge.f32.partialorder %v966_v11, 0.0  ;;  %vm999_vm0 = vcmp.ge.f32.partialorder %v935_v28, 0.0  ;;  %v802_v59 = vpop.f32.mrf.mxu1 }
 0x203   : > { %1574 = vadd.xlane.f32.xlu2 %v3403_v55  ;;  %1284 = vmax.xlane.f32.xlu1 %v3410_v39 }
 0x204   : > { %v1553_v24 = vpop.xlane.xlu0 %1552  ;;  %v967_v61 = vadd.f32 %v3173_v58, %v896_v3  ;;  %v593_v22 = vpop.f32.mrf.mxu0 }
 0x205   : > { %2197 = vrcp.f32 %v1553_v24  ;;  %v2194_v38 = vpop.eup %2193  ;;  %v1094_v24 = vmul.f32 0.01, %v966_v11 }
 0x206   : > { %v1617_v43 = vpop.xlane.xlu2 %1616  ;;  %v1773_v7 = vmul.f32 %v2194_v38, %v3146_v1  ;;  %v3420_v10 = vpop.xlane.xlu1 %1326  ;;  %vm1031_vm2 = vcmp.ge.f32.partialorder %v967_v61, 0.0 }
 0x207   : > { %2199 = vrcp.f32 %v1617_v43  ;;  %v3429_v29 = vpop.eup %2195 }
 0x208   : > { %1837 = vst [vmem:[%s3375_s28 + $0x108] sm:$0xff] %v1773_v7  ;;  %2201 = vpow2.f32 %v1448_v14  ;;  %v1063_v14 = vmul.f32 0.01, %v935_v28  ;;  %v1095_v7 = vmul.f32 0.01, %v967_v61 }
 0x209   : > { %1348 = vmax.xlane.f32.xlu0 %v3417_v37  ;;  %2203 = vpow2.f32 %v1512_v42 }
 0x20a   : > { %v1127_v3 = vsel %vm999_vm0, %v935_v28, %v1063_v14 }
 0x20b   : > { %v2198_v1 = vpop.eup %2197  ;;  %1286 = vmax.xlane.f32.xlu2 %v3425_v4  ;;  %1638 = vadd.xlane.f32.xlu1 %v3429_v29 }
 0x20c   : > { %v1742_v57 = vmul.f32 %v2198_v1, %v3152_v16  ;;  %v3437_v21 = vpop.xlane.xlu0 %1264  ;;  %v1158_v16 = vsel %vm1030_vm15, %v966_v11, %v1094_v24  ;;  %v689_v11 = vpop.f32.mrf.mxu2  ;;  %v1372_v1 = vsub.f32 %v3131_v33, %v3368_v19 }
 0x20d   : > { %v2200_v47 = vpop.eup %2199  ;;  %v3455_v42 = vsel %vm1163_vm1, %v1158_v16, -inf  ;;  %v898_v24 = vpop.f32.mrf.mxu3 }
 0x20e   : > { %1806 = vst [vmem:[%s3375_s28 + $0x10] sm:$0xff] %v1742_v57  ;;  %v1774_v50 = vmul.f32 %v2200_v47, %v3156_v26  ;;  %v3442_v62 = vpop.xlane.xlu2 %1328  ;;  %v1555_v38 = vpop.xlane.xlu1 %1554  ;;  %v1403_v26 = vsub.f32 %v3110_v48, %v3349_v44  ;;  %v803_v57 = vadd.f32 %v802_v59, %v593_v22  ;;  %v1159_v48 = vsel %vm1031_vm2, %v967_v61, %v1095_v7 }
 0x20f   : > { %v3444_v43 = vpop.eup %2201  ;;  %2205 = vrcp.f32 %v1555_v38  ;;  %v3462_v38 = vsel %vm1163_vm1, %v1127_v3, -inf  ;;  %v899_v33 = vadd.f32 %v898_v24, %v689_v11  ;;  %v1452_v19 = vmul.f32 1.442695, %v1372_v1 }
 0x210   : > { %1838 = vst [vmem:[%s3375_s28 + $0x110] sm:$0xff] %v1774_v50  ;;  %v3448_v31 = vpop.eup %2203  ;;  %2207 = vpow2.f32 %v1450_v52  ;;  %v1514_v47 = vmul.f32 1.442695, %v1403_v26  ;;  %v936_v52 = vadd.f32 %v3173_v58, %v803_v57  ;;  %v3468_v16 = vsel %vm1163_vm1, %v1159_v48, -inf }
 0x211   : > { %1576 = vadd.xlane.f32.xlu0 %v3444_v43  ;;  %v968_v59 = vadd.f32 %v3173_v58, %v899_v33  ;;  %v1405_v7 = vsub.f32 %v3162_v34, %v3420_v10  ;;  %v1373_v10 = vsub.f32 %v3143_v56, %v3397_v6  ;;  %v1406_v41 = vsub.f32 %v3178_v60, %v3442_v62 }
 0x212   : > { %v1064_v11 = vmul.f32 0.01, %v936_v52  ;;  %vm1000_vm3 = vcmp.ge.f32.partialorder %v936_v52, 0.0 }
 0x213   : > { %1640 = vadd.xlane.f32.xlu2 %v3448_v31  ;;  %1350 = vmax.xlane.f32.xlu1 %v3455_v42  ;;  %v1096_v57 = vmul.f32 0.01, %v968_v59  ;;  %v1518_v48 = vmul.f32 1.442695, %v1405_v7  ;;  %vm1032_vm4 = vcmp.ge.f32.partialorder %v968_v59, 0.0 }
 0x214   : > { %v1619_v51 = vpop.xlane.xlu0 %1618  ;;  %v1128_v34 = vsel %vm1000_vm3, %v936_v52, %v1064_v11  ;;  %v1454_v6 = vmul.f32 1.442695, %v1373_v10 }
 0x215   : > { %2209 = vrcp.f32 %v1619_v51  ;;  %v2206_v44 = vpop.eup %2205 }
 0x216   : > { %v1557_v50 = vpop.xlane.xlu2 %1556  ;;  %v1743_v28 = vmul.f32 %v2206_v44, %v3181_v2  ;;  %v1267_v14 = vpop.xlane.xlu1 %1266  ;;  %v1404_v2 = vsub.f32 %v3137_v23, %v3392_v45  ;;  %v1160_v44 = vsel %vm1032_vm4, %v968_v59, %v1096_v57 }
 0x217   : > { %2211 = vrcp.f32 %v1557_v50  ;;  %v3472_v61 = vpop.eup %2207 }
 0x218   : > { %1807 = vst [vmem:[%s3375_s28 + $0x18] sm:$0xff] %v1743_v28  ;;  %2213 = vpow2.f32 %v1514_v47  ;;  %v1516_v51 = vmul.f32 1.442695, %v1404_v2  ;;  %v1375_v47 = vsub.f32 %v3197_v36, %v1267_v14  ;;  %v1374_v28 = vsub.f32 %v3168_v46, %v3437_v21 }
 0x219   : > { %1288 = vmax.xlane.f32.xlu0 %v3462_v38  ;;  %2215 = vpow2.f32 %v1452_v19  ;;  %v3505_v19 = vsel %vm1163_vm1, %v1160_v44, -inf }
 0x21a   : > { %v1458_v2 = vmul.f32 1.442695, %v1375_v47  ;;  %v1456_v14 = vmul.f32 1.442695, %v1374_v28 }
 0x21b   : > { %v2210_v22 = vpop.eup %2209  ;;  %1352 = vmax.xlane.f32.xlu2 %v3468_v16  ;;  %1578 = vadd.xlane.f32.xlu1 %v3472_v61 }
 0x21c   : > { %v1775_v26 = vmul.f32 %v2210_v22, %v3188_v25  ;;  %v1331_v3 = vpop.xlane.xlu0 %1330 }
 0x21d   : > { %v2212_v1 = vpop.eup %2211  ;;  %v1407_v59 = vsub.f32 %v3203_v27, %v1331_v3 }
 0x21e   : > { %1839 = vst [vmem:[%s3375_s28 + $0x118] sm:$0xff] %v1775_v26  ;;  %v1744_v23 = vmul.f32 %v2212_v1, %v3191_v35  ;;  %v3484_v45 = vpop.xlane.xlu2 %1268  ;;  %v1621_v58 = vpop.xlane.xlu1 %1620  ;;  %v3497_v35 = vsel %vm1163_vm1, %v1128_v34, -inf  ;;  %v1520_v1 = vmul.f32 1.442695, %v1406_v41  ;;  %v3830_v41 = vld [vmem:[#allocation18_spill] sm:$0xff] }
 0x21f   : > { %v3486_v24 = vpop.eup %2213  ;;  %2217 = vrcp.f32 %v1621_v58 }
 0x220   : > { %1808 = vst [vmem:[%s3375_s28 + $0x20] sm:$0xff] %v1744_v23  ;;  %v3490_v25 = vpop.eup %2215  ;;  %2219 = vpow2.f32 %v1516_v51  ;;  %v1522_v23 = vmul.f32 1.442695, %v1407_v59 }
 0x221   : > { %1642 = vadd.xlane.f32.xlu0 %v3486_v24  ;;  %2221 = vpow2.f32 %v1518_v48 }
 0x223   : > { %1580 = vadd.xlane.f32.xlu2 %v3490_v25  ;;  %1290 = vmax.xlane.f32.xlu1 %v3497_v35 }
 0x224   : > { %v1559_v50 = vpop.xlane.xlu0 %1558 }
 0x225   : > { %2223 = vrcp.f32 %v1559_v50  ;;  %v2218_v56 = vpop.eup %2217 }
 0x226   : > { %v1623_v33 = vpop.xlane.xlu2 %1622  ;;  %v1776_v52 = vmul.f32 %v2218_v56, %v3211_v9  ;;  %v1333_v22 = vpop.xlane.xlu1 %1332 }
 0x227   : > { %2225 = vrcp.f32 %v1623_v33  ;;  %v3508_v36 = vpop.eup %2219  ;;  %v1408_v7 = vsub.f32 %v3227_v63, %v1333_v22  ;;  %v1376_v63 = vsub.f32 %v3208_v32, %v3484_v45  ;;  %v3829_v33 = vld [vmem:[#allocation17_spill] sm:$0xff] }
 0x228   : > { %1840 = vst [vmem:[%s3375_s28 + $0x120] sm:$0xff] %v1776_v52  ;;  %v3512_v46 = vpop.eup %2221  ;;  %2227 = vpow2.f32 %v1454_v6 }
 0x229   : > { %1354 = vmax.xlane.f32.xlu0 %v3505_v19  ;;  %2229 = vpow2.f32 %v1458_v2  ;;  %v1524_v51 = vmul.f32 1.442695, %v1408_v7  ;;  %v1460_v34 = vmul.f32 1.442695, %v1376_v63 }
 0x22a   : > { %2231 = vpow2.f32 %v1456_v14 }
 0x22b   : > { %v2224_v21 = vpop.eup %2223  ;;  %1646 = vadd.xlane.f32.xlu2 %v3512_v46  ;;  %1644 = vadd.xlane.f32.xlu1 %v3508_v36 }
 0x22c   : > { %v1745_v9 = vmul.f32 %v2224_v21, %v3218_v12  ;;  %v1271_v26 = vpop.xlane.xlu0 %1270 }
 0x22d   : > { %v2226_v11 = vpop.eup %2225  ;;  %v1377_v57 = vsub.f32 %v3233_v54, %v1271_v26 }
 0x22e   : > { %1809 = vst [vmem:[%s3375_s28 + $0x28] sm:$0xff] %v1745_v9  ;;  %v1777_v60 = vmul.f32 %v2226_v11, %v3221_v49  ;;  %v1335_v62 = vpop.xlane.xlu2 %1334  ;;  %v1561_v27 = vpop.xlane.xlu1 %1560  ;;  %v3831_v11 = vld [vmem:[#allocation19_spill] sm:$0xff] }
 0x22f   : > { %v3523_v3 = vpop.eup %2227  ;;  %2233 = vrcp.f32 %v1561_v27  ;;  %v1462_v28 = vmul.f32 1.442695, %v1377_v57  ;;  %v1409_v56 = vsub.f32 %v3238_v0, %v1335_v62 }
 0x230   : > { %1841 = vst [vmem:[%s3375_s28 + $0x128] sm:$0xff] %v1777_v60  ;;  %v3527_v12 = vpop.eup %2229  ;;  %2235 = vpow2.f32 %v1520_v1 }
 0x231   : > { %1582 = vadd.xlane.f32.xlu0 %v3523_v3  ;;  %v3531_v58 = vpop.eup %2231  ;;  %2237 = vpow2.f32 %v1522_v23  ;;  %v1526_v14 = vmul.f32 1.442695, %v1409_v56 }
 0x232   : > { %2239 = vpow2.f32 %v1524_v51  ;;  %v3832_v51 = vld [vmem:[#allocation20_spill] sm:$0xff] }
 0x233   : > { %1586 = vadd.xlane.f32.xlu2 %v3527_v12  ;;  %1584 = vadd.xlane.f32.xlu1 %v3531_v58 }
 0x234   : > { %v1625_v49 = vpop.xlane.xlu0 %1624 }
 0x235   : > { %2241 = vrcp.f32 %v1625_v49  ;;  %v2234_v48 = vpop.eup %2233 }
 0x236   : > { %v1563_v10 = vpop.xlane.xlu2 %1562  ;;  %v1746_v44 = vmul.f32 %v2234_v48, %v3241_v30  ;;  %v1273_v32 = vpop.xlane.xlu1 %1272 }
 0x237   : > { %2243 = vrcp.f32 %v1563_v10  ;;  %v3537_v45 = vpop.eup %2235  ;;  %v1378_v47 = vsub.f32 %v3257_v15, %v1273_v32  ;;  %v3833_v32 = vld [vmem:[#allocation21_spill] sm:$0xff] }
 0x238   : > { %v3540_v50 = vpop.eup %2237  ;;  %1810 = vst [vmem:[%s3375_s28 + $0x30] sm:$0xff] %v1746_v44  ;;  %2245 = vpow2.f32 %v1460_v34 }
 0x239   : > { %1648 = vadd.xlane.f32.xlu0 %v3537_v45  ;;  %v3544_v54 = vpop.eup %2239  ;;  %v1464_v6 = vmul.f32 1.442695, %v1378_v47 }
 0x23b   : > { %v2242_v30 = vpop.eup %2241  ;;  %1652 = vadd.xlane.f32.xlu2 %v3544_v54  ;;  %2247 = vpow2.f32 %v1464_v6  ;;  %1650 = vadd.xlane.f32.xlu1 %v3540_v50  ;;  %v3834_v6 = vld [vmem:[#allocation23_spill] sm:$0xff] }
 0x23c   : > { %v1778_v52 = vmul.f32 %v2242_v30, %v3829_v33  ;;  %v1337_v15 = vpop.xlane.xlu0 %1336  ;;  %2249 = vpow2.f32 %v1462_v28 }
 0x23d   : > { %v2244_v22 = vpop.eup %2243  ;;  %v1410_v2 = vsub.f32 %v3263_v20, %v1337_v15 }
 0x23e   : > { %1842 = vst [vmem:[%s3375_s28 + $0x130] sm:$0xff] %v1778_v52  ;;  %v1747_v21 = vmul.f32 %v2244_v22, %v3830_v41  ;;  %v1275_v0 = vpop.xlane.xlu2 %1274  ;;  %v1627_v59 = vpop.xlane.xlu1 %1626  ;;  %v3836_v22 = vld [vmem:[#allocation24_spill] sm:$0xff] }
 0x23f   : > { %v3553_v9 = vpop.eup %2245  ;;  %v1528_v7 = vmul.f32 1.442695, %v1410_v2  ;;  %2251 = vrcp.f32 %v1627_v59  ;;  %v1379_v1 = vsub.f32 %v3831_v11, %v1275_v0 }
 0x240   : > { %1811 = vst [vmem:[%s3375_s28 + $0x38] sm:$0xff] %v1747_v21  ;;  %2253 = vpow2.f32 %v1526_v14 }
 0x241   : > { %1588 = vadd.xlane.f32.xlu0 %v3553_v9  ;;  %v3557_v26 = vpop.eup %2247  ;;  %2255 = vpow2.f32 %v1528_v7  ;;  %v1466_v23 = vmul.f32 1.442695, %v1379_v1 }
 0x242   : > { %v3560_v20 = vpop.eup %2249 }
 0x243   : > { %1592 = vadd.xlane.f32.xlu2 %v3557_v26  ;;  %1590 = vadd.xlane.f32.xlu1 %v3560_v20 }
 0x244   : > { %v1565_v60 = vpop.xlane.xlu0 %1564 }
 0x245   : > { %2257 = vrcp.f32 %v1565_v60  ;;  %v2252_v62 = vpop.eup %2251  ;;  %v3837_v60 = vld [vmem:[#allocation25_spill] sm:$0xff] }
 0x246   : > { %v1629_v27 = vpop.xlane.xlu2 %1628  ;;  %v1779_v63 = vmul.f32 %v2252_v62, %v3832_v51  ;;  %v1339_v49 = vpop.xlane.xlu1 %1338 }
 0x247   : > { %2259 = vrcp.f32 %v1629_v27  ;;  %v3565_v57 = vpop.eup %2253  ;;  %v1411_v48 = vsub.f32 %v3287_v53, %v1339_v49  ;;  %v3835_v53 = vld [vmem:[#allocation22_spill] sm:$0xff] }
 0x248   : > { %1843 = vst [vmem:[%s3375_s28 + $0x138] sm:$0xff] %v1779_v63  ;;  %v3570_v34 = vpop.eup %2255  ;;  %2261 = vpow2.f32 %v1466_v23 }
 0x249   : > { %1654 = vadd.xlane.f32.xlu0 %v3565_v57  ;;  %v1530_v10 = vmul.f32 1.442695, %v1411_v48  ;;  %v3838_v48 = vld [vmem:[#allocation26_spill] sm:$0xff] }
 0x24b   : > { %v2258_v44 = vpop.eup %2257  ;;  %2263 = vpow2.f32 %v1530_v10  ;;  %1656 = vadd.xlane.f32.xlu1 %v3570_v34 }
 0x24c   : > { %v1748_v47 = vmul.f32 %v2258_v44, %v3833_v32  ;;  %v1277_v28 = vpop.xlane.xlu0 %1276 }
 0x24d   : > { %v2260_v56 = vpop.eup %2259  ;;  %v1380_v30 = vsub.f32 %v3834_v6, %v1277_v28 }
 0x24e   : > { %1812 = vst [vmem:[%s3375_s28 + $0x40] sm:$0xff] %v1748_v47  ;;  %v1780_v33 = vmul.f32 %v2260_v56, %v3835_v53  ;;  %v1341_v52 = vpop.xlane.xlu2 %1340  ;;  %v1567_v14 = vpop.xlane.xlu1 %1566  ;;  %v3839_v47 = vld [vmem:[#allocation28_spill] sm:$0xff]  ;;  %v3840_v56 = vld [vmem:[#allocation27_spill] sm:$0xff]  ;;  %v3841_v53 = vld [vmem:[#allocation29_spill] sm:$0xff] }
 0x24f   : > { %v1468_v15 = vmul.f32 1.442695, %v1380_v30  ;;  %v1412_v2 = vsub.f32 %v3836_v22, %v1341_v52  ;;  %v3578_v41 = vpop.eup %2261  ;;  %2265 = vrcp.f32 %v1567_v14 }
 0x250   : > { %1844 = vst [vmem:[%s3375_s28 + $0x140] sm:$0xff] %v1780_v33 }
 0x251   : > { %2267 = vpow2.f32 %v1468_v15  ;;  %v1532_v21 = vmul.f32 1.442695, %v1412_v2  ;;  %1594 = vadd.xlane.f32.xlu0 %v3578_v41  ;;  %v3582_v0 = vpop.eup %2263 }
 0x252   : > { %1658 = vadd.xlane.f32.xlu2 %v3582_v0 }
 0x253   : > { %2269 = vpow2.f32 %v1532_v21 }
 0x254   : > { %v1631_v59 = vpop.xlane.xlu0 %1630 }
 0x255   : > { %2271 = vrcp.f32 %v1631_v59  ;;  %v2266_v7 = vpop.eup %2265 }
 0x256   : > { %v1569_v11 = vpop.xlane.xlu2 %1568  ;;  %v1749_v62 = vmul.f32 %v2266_v7, %v3837_v60  ;;  %v1279_v23 = vpop.xlane.xlu1 %1278  ;;  %v3842_v7 = vld [vmem:[#allocation30_spill] sm:$0xff] }
 0x257   : > { %v3585_v1 = vpop.eup %2267  ;;  %2273 = vrcp.f32 %v1569_v11  ;;  %v1381_v27 = vsub.f32 %v3321_v8, %v1279_v23 }
 0x258   : > { %1596 = vadd.xlane.f32.xlu1 %v3585_v1  ;;  %1813 = vst [vmem:[%s3375_s28 + $0x48] sm:$0xff] %v1749_v62 }
 0x259   : > { %v3590_v51 = vpop.eup %2269  ;;  %v1470_v63 = vmul.f32 1.442695, %v1381_v27 }
 0x25a   : > { %1660 = vadd.xlane.f32.xlu0 %v3590_v51 }
 0x25b   : > { %v2272_v49 = vpop.eup %2271  ;;  %2275 = vpow2.f32 %v1470_v63 }
 0x25c   : > { %v1781_v10 = vmul.f32 %v2272_v49, %v3838_v48  ;;  %v1343_v44 = vpop.xlane.xlu0 %1342  ;;  %v3843_v49 = vld [vmem:[#allocation31_spill] sm:$0xff] }
 0x25d   : > { %v2274_v32 = vpop.eup %2273  ;;  %v1413_v28 = vsub.f32 %v3839_v47, %v1343_v44  ;;  %v3844_v47 = vld [vmem:[#allocation32_spill] sm:$0xff] }
 0x25e   : > { %1845 = vst [vmem:[%s3375_s28 + $0x148] sm:$0xff] %v1781_v10  ;;  %v1750_v8 = vmul.f32 %v2274_v32, %v3840_v56  ;;  %v1281_v6 = vpop.xlane.xlu2 %1280  ;;  %v1633_v52 = vpop.xlane.xlu1 %1632 }
 0x25f   : > { %v1534_v30 = vmul.f32 1.442695, %v1413_v28  ;;  %v1382_v33 = vsub.f32 %v3841_v53, %v1281_v6  ;;  %2277 = vrcp.f32 %v1633_v52 }
 0x260   : > { %1814 = vst [vmem:[%s3375_s28 + $0x50] sm:$0xff] %v1750_v8 }
 0x261   : > { %2279 = vpow2.f32 %v1534_v30  ;;  %v1472_v15 = vmul.f32 1.442695, %v1382_v33  ;;  %v3600_v22 = vpop.eup %2275 }
 0x262   : > { %1598 = vadd.xlane.f32.xlu2 %v3600_v22 }
 0x263   : > { %2281 = vpow2.f32 %v1472_v15 }
 0x264   : > { %v1571_v2 = vpop.xlane.xlu0 %1570 }
 0x265   : > { %2283 = vrcp.f32 %v1571_v2  ;;  %v2278_v14 = vpop.eup %2277 }
 0x266   : > { %v1635_v21 = vpop.xlane.xlu2 %1634  ;;  %v1782_v11 = vmul.f32 %v2278_v14, %v3842_v7  ;;  %v1345_v60 = vpop.xlane.xlu1 %1344 }
 0x267   : > { %v3603_v59 = vpop.eup %2279  ;;  %2285 = vrcp.f32 %v1635_v21  ;;  %v1414_v62 = vsub.f32 %v3362_v40, %v1345_v60 }
 0x268   : > { %1662 = vadd.xlane.f32.xlu1 %v3603_v59  ;;  %1846 = vst [vmem:[%s3375_s28 + $0x150] sm:$0xff] %v1782_v11 }
 0x269   : > { %v3608_v23 = vpop.eup %2281  ;;  %v1536_v27 = vmul.f32 1.442695, %v1414_v62 }
 0x26a   : > { %1600 = vadd.xlane.f32.xlu0 %v3608_v23 }
 0x26b   : > { %v2284_v63 = vpop.eup %2283  ;;  %2287 = vpow2.f32 %v1536_v27 }
 0x26c   : > { %v1751_v48 = vmul.f32 %v2284_v63, %v3843_v49  ;;  %v1283_v10 = vpop.xlane.xlu0 %1282 }
 0x26d   : > { %v2286_v44 = vpop.eup %2285  ;;  %v1383_v32 = vsub.f32 %v3372_v18, %v1283_v10 }
 0x26e   : > { %1815 = vst [vmem:[%s3375_s28 + $0x58] sm:$0xff] %v1751_v48  ;;  %v1783_v40 = vmul.f32 %v2286_v44, %v3844_v47  ;;  %v1347_v28 = vpop.xlane.xlu2 %1346  ;;  %v1573_v6 = vpop.xlane.xlu1 %1572 }
 0x26f   : > { %v1474_v56 = vmul.f32 1.442695, %v1383_v32  ;;  %v1415_v8 = vsub.f32 %v3381_v5, %v1347_v28  ;;  %2289 = vrcp.f32 %v1573_v6 }
 0x270   : > { %1847 = vst [vmem:[%s3375_s28 + $0x158] sm:$0xff] %v1783_v40 }
 0x271   : > { %2291 = vpow2.f32 %v1474_v56  ;;  %v1538_v30 = vmul.f32 1.442695, %v1415_v8  ;;  %v3618_v53 = vpop.eup %2287 }
 0x272   : > { %1664 = vadd.xlane.f32.xlu2 %v3618_v53 }
 0x273   : > { %2293 = vpow2.f32 %v1538_v30 }
 0x274   : > { %v1637_v33 = vpop.xlane.xlu0 %1636 }
 0x275   : > { %2295 = vrcp.f32 %v1637_v33  ;;  %v2290_v18 = vpop.eup %2289 }
 0x276   : > { %v1575_v52 = vpop.xlane.xlu2 %1574  ;;  %v1752_v5 = vmul.f32 %v2290_v18, %v3384_v13  ;;  %v1285_v2 = vpop.xlane.xlu1 %1284 }
 0x277   : > { %v3621_v15 = vpop.eup %2291  ;;  %2297 = vrcp.f32 %v1575_v52  ;;  %v1384_v14 = vsub.f32 %v3410_v39, %v1285_v2 }
 0x278   : > { %1602 = vadd.xlane.f32.xlu1 %v3621_v15  ;;  %1816 = vst [vmem:[%s3375_s28 + $0x60] sm:$0xff] %v1752_v5 }
 0x279   : > { %v3626_v21 = vpop.eup %2293  ;;  %v1476_v7 = vmul.f32 1.442695, %v1384_v14 }
 0x27a   : > { %1666 = vadd.xlane.f32.xlu0 %v3626_v21 }
 0x27b   : > { %v2296_v11 = vpop.eup %2295  ;;  %2299 = vpow2.f32 %v1476_v7 }
 0x27c   : > { %v1784_v60 = vmul.f32 %v2296_v11, %v3399_v17  ;;  %v1349_v62 = vpop.xlane.xlu0 %1348 }
 0x27d   : > { %v2298_v27 = vpop.eup %2297  ;;  %v1416_v13 = vsub.f32 %v3417_v37, %v1349_v62 }
 0x27e   : > { %1848 = vst [vmem:[%s3375_s28 + $0x160] sm:$0xff] %v1784_v60  ;;  %v1753_v39 = vmul.f32 %v2298_v27, %v3403_v55  ;;  %v1287_v63 = vpop.xlane.xlu2 %1286  ;;  %v1639_v10 = vpop.xlane.xlu1 %1638 }
 0x27f   : > { %v1540_v49 = vmul.f32 1.442695, %v1416_v13  ;;  %v1385_v48 = vsub.f32 %v3425_v4, %v1287_v63  ;;  %2301 = vrcp.f32 %v1639_v10 }
 0x280   : > { %1817 = vst [vmem:[%s3375_s28 + $0x68] sm:$0xff] %v1753_v39 }
 0x281   : > { %2303 = vpow2.f32 %v1540_v49  ;;  %v1478_v44 = vmul.f32 1.442695, %v1385_v48  ;;  %v3636_v32 = vpop.eup %2299 }
 0x282   : > { %1604 = vadd.xlane.f32.xlu2 %v3636_v32 }
 0x283   : > { %2305 = vpow2.f32 %v1478_v44 }
 0x284   : > { %v1577_v17 = vpop.xlane.xlu0 %1576 }
 0x285   : > { %2307 = vrcp.f32 %v1577_v17  ;;  %v2302_v37 = vpop.eup %2301 }
 0x286   : > { %v1641_v55 = vpop.xlane.xlu2 %1640  ;;  %v1785_v4 = vmul.f32 %v2302_v37, %v3429_v29  ;;  %v1351_v40 = vpop.xlane.xlu1 %1350 }
 0x287   : > { %v3639_v47 = vpop.eup %2303  ;;  %2309 = vrcp.f32 %v1641_v55  ;;  %v1417_v39 = vsub.f32 %v3455_v42, %v1351_v40 }
 0x288   : > { %1668 = vadd.xlane.f32.xlu1 %v3639_v47  ;;  %1849 = vst [vmem:[%s3375_s28 + $0x168] sm:$0xff] %v1785_v4 }
 0x289   : > { %v3643_v28 = vpop.eup %2305  ;;  %v1542_v37 = vmul.f32 1.442695, %v1417_v39 }
 0x28a   : > { %1606 = vadd.xlane.f32.xlu0 %v3643_v28 }
 0x28b   : > { %v2308_v56 = vpop.eup %2307 }
 0x28c   : > { %v1754_v8 = vmul.f32 %v2308_v56, %v3444_v43  ;;  %v1289_v6 = vpop.xlane.xlu0 %1288 }
 0x28d   : > { %v2310_v30 = vpop.eup %2309  ;;  %v1386_v33 = vsub.f32 %v3462_v38, %v1289_v6 }
 0x28e   : > { %1818 = vst [vmem:[%s3375_s28 + $0x70] sm:$0xff] %v1754_v8  ;;  %v1786_v29 = vmul.f32 %v2310_v30, %v3448_v31  ;;  %v1353_v18 = vpop.xlane.xlu2 %1352  ;;  %v1579_v2 = vpop.xlane.xlu1 %1578 }
 0x28f   : > { %v1480_v52 = vmul.f32 1.442695, %v1386_v33  ;;  %v1418_v5 = vsub.f32 %v3468_v16, %v1353_v18  ;;  %2311 = vrcp.f32 %v1579_v2 }
 0x290   : > { %1850 = vst [vmem:[%s3375_s28 + $0x170] sm:$0xff] %v1786_v29 }
 0x291   : > { %2313 = vpow2.f32 %v1480_v52  ;;  %v1544_v14 = vmul.f32 1.442695, %v1418_v5 }
 0x293   : > { %2315 = vpow2.f32 %v1544_v14 }
 0x294   : > { %v1643_v7 = vpop.xlane.xlu0 %1642 }
 0x295   : > { %2317 = vrcp.f32 %v1643_v7  ;;  %v2312_v43 = vpop.eup %2311 }
 0x296   : > { %v1581_v11 = vpop.xlane.xlu2 %1580  ;;  %v1755_v38 = vmul.f32 %v2312_v43, %v3472_v61  ;;  %v1291_v31 = vpop.xlane.xlu1 %1290 }
 0x297   : > { %v3653_v60 = vpop.eup %2313  ;;  %2319 = vrcp.f32 %v1581_v11  ;;  %v1387_v16 = vsub.f32 %v3497_v35, %v1291_v31 }
 0x298   : > { %1608 = vadd.xlane.f32.xlu1 %v3653_v60  ;;  %1819 = vst [vmem:[%s3375_s28 + $0x78] sm:$0xff] %v1755_v38 }
 0x299   : > { %v3658_v62 = vpop.eup %2315  ;;  %v1482_v27 = vmul.f32 1.442695, %v1387_v16 }
 0x29a   : > { %1672 = vadd.xlane.f32.xlu0 %v3658_v62 }
 0x29b   : > { %v2318_v13 = vpop.eup %2317  ;;  %2321 = vpow2.f32 %v1482_v27 }
 0x29c   : > { %v1787_v63 = vmul.f32 %v2318_v13, %v3486_v24  ;;  %v1355_v61 = vpop.xlane.xlu0 %1354 }
 0x29d   : > { %v2320_v49 = vpop.eup %2319  ;;  %v1419_v48 = vsub.f32 %v3505_v19, %v1355_v61 }
 0x29e   : > { %1851 = vst [vmem:[%s3375_s28 + $0x178] sm:$0xff] %v1787_v63  ;;  %v1756_v35 = vmul.f32 %v2320_v49, %v3490_v25  ;;  %v1647_v10 = vpop.xlane.xlu2 %1646  ;;  %v1645_v17 = vpop.xlane.xlu1 %1644 }
 0x29f   : > { %v1546_v44 = vmul.f32 1.442695, %v1419_v48  ;;  %2323 = vrcp.f32 %v1647_v10 }
 0x2a0   : > { %1820 = vst [vmem:[%s3375_s28 + $0x80] sm:$0xff] %v1756_v35  ;;  %2325 = vrcp.f32 %v1645_v17 }
 0x2a1   : > { %2327 = vpow2.f32 %v1546_v44  ;;  %v3668_v42 = vpop.eup %2321 }
 0x2a2   : > { %1610 = vadd.xlane.f32.xlu2 %v3668_v42  ;;  %2329 = vpow2.f32 %v1542_v37 }
 0x2a4   : > { %v1583_v24 = vpop.xlane.xlu0 %1582 }
 0x2a5   : > { %v2324_v19 = vpop.eup %2323  ;;  %2331 = vrcp.f32 %v1583_v24 }
 0x2a6   : > { %v2326_v55 = vpop.eup %2325  ;;  %v1789_v25 = vmul.f32 %v2324_v19, %v3512_v46  ;;  %v1587_v4 = vpop.xlane.xlu2 %1586 }
 0x2a7   : > { %v3672_v40 = vpop.eup %2327  ;;  %v1788_v56 = vmul.f32 %v2326_v55, %v3508_v36  ;;  %2333 = vrcp.f32 %v1587_v4  ;;  %v1585_v8 = vpop.xlane.xlu1 %1584 }
 0x2a8   : > { %1853 = vst [vmem:[%s3375_s28 + $0x188] sm:$0xff] %v1789_v25  ;;  %2335 = vrcp.f32 %v1585_v8  ;;  %1674 = vadd.xlane.f32.xlu1 %v3672_v40  ;;  %v3678_v6 = vpop.eup %2329 }
 0x2a9   : > { %1852 = vst [vmem:[%s3375_s28 + $0x180] sm:$0xff] %v1788_v56 }
 0x2aa   : > { %1670 = vadd.xlane.f32.xlu2 %v3678_v6 }
 0x2ab   : > { %v2332_v30 = vpop.eup %2331 }
 0x2ac   : > { %v1757_v46 = vmul.f32 %v2332_v30, %v3523_v3  ;;  %v1649_v33 = vpop.xlane.xlu0 %1648 }
 0x2ad   : > { %v2334_v29 = vpop.eup %2333  ;;  %2337 = vrcp.f32 %v1649_v33 }
 0x2ae   : > { %v2336_v36 = vpop.eup %2335  ;;  %1821 = vst [vmem:[%s3375_s28 + $0x88] sm:$0xff] %v1757_v46  ;;  %v1759_v18 = vmul.f32 %v2334_v29, %v3527_v12  ;;  %v1653_v52 = vpop.xlane.xlu2 %1652 }
 0x2af   : > { %v1758_v5 = vmul.f32 %v2336_v36, %v3531_v58  ;;  %2339 = vrcp.f32 %v1653_v52  ;;  %v1651_v2 = vpop.xlane.xlu1 %1650 }
 0x2b0   : > { %1823 = vst [vmem:[%s3375_s28 + $0x98] sm:$0xff] %v1759_v18  ;;  %2341 = vrcp.f32 %v1651_v2 }
 0x2b1   : > { %1822 = vst [vmem:[%s3375_s28 + $0x90] sm:$0xff] %v1758_v5 }
 0x2b3   : > { %v2338_v14 = vpop.eup %2337 }
 0x2b4   : > { %v1790_v3 = vmul.f32 %v2338_v14, %v3537_v45  ;;  %v1589_v7 = vpop.xlane.xlu0 %1588 }
 0x2b5   : > { %v2340_v43 = vpop.eup %2339  ;;  %2343 = vrcp.f32 %v1589_v7 }
 0x2b6   : > { %v2342_v11 = vpop.eup %2341  ;;  %1854 = vst [vmem:[%s3375_s28 + $0x190] sm:$0xff] %v1790_v3  ;;  %v1792_v12 = vmul.f32 %v2340_v43, %v3544_v54  ;;  %v1593_v38 = vpop.xlane.xlu2 %1592 }
 0x2b7   : > { %v1791_v58 = vmul.f32 %v2342_v11, %v3540_v50  ;;  %2345 = vrcp.f32 %v1593_v38  ;;  %v1591_v31 = vpop.xlane.xlu1 %1590 }
 0x2b8   : > { %1856 = vst [vmem:[%s3375_s28 + $0x1a0] sm:$0xff] %v1792_v12  ;;  %2347 = vrcp.f32 %v1591_v31 }
 0x2b9   : > { %1855 = vst [vmem:[%s3375_s28 + $0x198] sm:$0xff] %v1791_v58 }
 0x2bb   : > { %v2344_v16 = vpop.eup %2343 }
 0x2bc   : > { %v1760_v45 = vmul.f32 %v2344_v16, %v3553_v9  ;;  %v1655_v27 = vpop.xlane.xlu0 %1654 }
 0x2bd   : > { %v2346_v13 = vpop.eup %2345  ;;  %2349 = vrcp.f32 %v1655_v27 }
 0x2be   : > { %v2348_v39 = vpop.eup %2347  ;;  %1824 = vst [vmem:[%s3375_s28 + $0xa0] sm:$0xff] %v1760_v45  ;;  %v1762_v54 = vmul.f32 %v2346_v13, %v3557_v26 }
 0x2bf   : > { %v1761_v50 = vmul.f32 %v2348_v39, %v3560_v20  ;;  %v1657_v63 = vpop.xlane.xlu1 %1656 }
 0x2c0   : > { %1826 = vst [vmem:[%s3375_s28 + $0xb0] sm:$0xff] %v1762_v54  ;;  %2351 = vrcp.f32 %v1657_v63 }
 0x2c1   : > { %1825 = vst [vmem:[%s3375_s28 + $0xa8] sm:$0xff] %v1761_v50 }
 0x2c3   : > { %v2350_v61 = vpop.eup %2349 }
 0x2c4   : > { %v1793_v49 = vmul.f32 %v2350_v61, %v3565_v57  ;;  %v1595_v9 = vpop.xlane.xlu0 %1594 }
 0x2c5   : > { %2353 = vrcp.f32 %v1595_v9  ;;  %v1659_v35 = vpop.xlane.xlu2 %1658 }
 0x2c6   : > { %v2352_v48 = vpop.eup %2351  ;;  %1857 = vst [vmem:[%s3375_s28 + $0x1a8] sm:$0xff] %v1793_v49  ;;  %2355 = vrcp.f32 %v1659_v35 }
 0x2c7   : > { %v1794_v10 = vmul.f32 %v2352_v48, %v3570_v34 }
 0x2c9   : > { %1858 = vst [vmem:[%s3375_s28 + $0x1b0] sm:$0xff] %v1794_v10 }
 0x2cb   : > { %v2354_v26 = vpop.eup %2353  ;;  %v1597_v20 = vpop.xlane.xlu1 %1596 }
 0x2cc   : > { %v1763_v44 = vmul.f32 %v2354_v26, %v3578_v41  ;;  %2357 = vrcp.f32 %v1597_v20  ;;  %v2356_v17 = vpop.eup %2355 }
 0x2cd   : > { %v1661_v37 = vpop.xlane.xlu0 %1660  ;;  %v1795_v57 = vmul.f32 %v2356_v17, %v3582_v0 }
 0x2ce   : > { %1827 = vst [vmem:[%s3375_s28 + $0xb8] sm:$0xff] %v1763_v44  ;;  %2359 = vrcp.f32 %v1661_v37 }
 0x2cf   : > { %1859 = vst [vmem:[%s3375_s28 + $0x1b8] sm:$0xff] %v1795_v57 }
 0x2d2   : > { %v2358_v24 = vpop.eup %2357 }
 0x2d3   : > { %v1764_v34 = vmul.f32 %v2358_v24, %v3585_v1 }
 0x2d4   : > { %v2360_v19 = vpop.eup %2359 }
 0x2d5   : > { %1828 = vst [vmem:[%s3375_s28 + $0xc0] sm:$0xff] %v1764_v34  ;;  %v1796_v55 = vmul.f32 %v2360_v19, %v3590_v51  ;;  %v1599_v25 = vpop.xlane.xlu2 %1598 }
 0x2d6   : > { %2361 = vrcp.f32 %v1599_v25 }
 0x2d7   : > { %1860 = vst [vmem:[%s3375_s28 + $0x1c0] sm:$0xff] %v1796_v55 }
 0x2db   : > { %v1663_v41 = vpop.xlane.xlu1 %1662 }
 0x2dc   : > { %2363 = vrcp.f32 %v1663_v41  ;;  %v2362_v4 = vpop.eup %2361 }
 0x2dd   : > { %v1601_v56 = vpop.xlane.xlu0 %1600  ;;  %v1765_v0 = vmul.f32 %v2362_v4, %v3600_v22 }
 0x2de   : > { %2365 = vrcp.f32 %v1601_v56 }
 0x2df   : > { %1829 = vst [vmem:[%s3375_s28 + $0xc8] sm:$0xff] %v1765_v0 }
 0x2e2   : > { %v2364_v8 = vpop.eup %2363 }
 0x2e3   : > { %v1797_v1 = vmul.f32 %v2364_v8, %v3603_v59 }
 0x2e4   : > { %v2366_v30 = vpop.eup %2365 }
 0x2e5   : > { %1861 = vst [vmem:[%s3375_s28 + $0x1c8] sm:$0xff] %v1797_v1  ;;  %v1766_v51 = vmul.f32 %v2366_v30, %v3608_v23  ;;  %v1665_v46 = vpop.xlane.xlu2 %1664 }
 0x2e6   : > { %2367 = vrcp.f32 %v1665_v46 }
 0x2e7   : > { %1830 = vst [vmem:[%s3375_s28 + $0xd0] sm:$0xff] %v1766_v51 }
 0x2eb   : > { %v1603_v33 = vpop.xlane.xlu1 %1602 }
 0x2ec   : > { %2369 = vrcp.f32 %v1603_v33  ;;  %v2368_v29 = vpop.eup %2367 }
 0x2ed   : > { %v1667_v36 = vpop.xlane.xlu0 %1666  ;;  %v1798_v22 = vmul.f32 %v2368_v29, %v3618_v53 }
 0x2ee   : > { %2371 = vrcp.f32 %v1667_v36 }
 0x2ef   : > { %1862 = vst [vmem:[%s3375_s28 + $0x1d0] sm:$0xff] %v1798_v22 }
 0x2f2   : > { %v2370_v18 = vpop.eup %2369 }
 0x2f3   : > { %v1767_v59 = vmul.f32 %v2370_v18, %v3621_v15 }
 0x2f4   : > { %v2372_v52 = vpop.eup %2371 }
 0x2f5   : > { %1831 = vst [vmem:[%s3375_s28 + $0xd8] sm:$0xff] %v1767_v59  ;;  %v1799_v23 = vmul.f32 %v2372_v52, %v3626_v21  ;;  %v1605_v5 = vpop.xlane.xlu2 %1604 }
 0x2f6   : > { %2373 = vrcp.f32 %v1605_v5 }
 0x2f7   : > { %1863 = vst [vmem:[%s3375_s28 + $0x1d8] sm:$0xff] %v1799_v23 }
 0x2fb   : > { %v1669_v2 = vpop.xlane.xlu1 %1668 }
 0x2fc   : > { %2375 = vrcp.f32 %v1669_v2  ;;  %v2374_v14 = vpop.eup %2373 }
 0x2fd   : > { %v1607_v3 = vpop.xlane.xlu0 %1606  ;;  %v1768_v53 = vmul.f32 %v2374_v14, %v3636_v32 }
 0x2fe   : > { %2377 = vrcp.f32 %v1607_v3 }
 0x2ff   : > { %1832 = vst [vmem:[%s3375_s28 + $0xe0] sm:$0xff] %v1768_v53 }
 0x302   : > { %v2376_v7 = vpop.eup %2375 }
 0x303   : > { %v1800_v15 = vmul.f32 %v2376_v7, %v3639_v47 }
 0x304   : > { %v2378_v43 = vpop.eup %2377 }
 0x305   : > { %1864 = vst [vmem:[%s3375_s28 + $0x1e0] sm:$0xff] %v1800_v15  ;;  %v1769_v21 = vmul.f32 %v2378_v43, %v3643_v28 }
 0x307   : > { %1833 = vst [vmem:[%s3375_s28 + $0xe8] sm:$0xff] %v1769_v21 }
 0x30b   : > { %v1609_v11 = vpop.xlane.xlu1 %1608 }
 0x30c   : > { %2379 = vrcp.f32 %v1609_v11 }
 0x30d   : > { %v1673_v12 = vpop.xlane.xlu0 %1672 }
 0x30e   : > { %2381 = vrcp.f32 %v1673_v12 }
 0x312   : > { %v2380_v38 = vpop.eup %2379 }
 0x313   : > { %v1770_v32 = vmul.f32 %v2380_v38, %v3653_v60 }
 0x314   : > { %v2382_v58 = vpop.eup %2381 }
 0x315   : > { %1834 = vst [vmem:[%s3375_s28 + $0xf0] sm:$0xff] %v1770_v32  ;;  %v1802_v31 = vmul.f32 %v2382_v58, %v3658_v62  ;;  %v1611_v47 = vpop.xlane.xlu2 %1610 }
 0x316   : > { %2383 = vrcp.f32 %v1611_v47 }
 0x317   : > { %1866 = vst [vmem:[%s3375_s28 + $0x1f0] sm:$0xff] %v1802_v31 }
 0x31b   : > { %v1675_v28 = vpop.xlane.xlu1 %1674 }
 0x31c   : > { %2385 = vrcp.f32 %v1675_v28  ;;  %v2384_v16 = vpop.eup %2383 }
 0x31d   : > { %v1771_v45 = vmul.f32 %v2384_v16, %v3668_v42  ;;  %v1671_v27 = vpop.xlane.xlu2 %1670 }
 0x31e   : > { %2387 = vrcp.f32 %v1671_v27 }
 0x31f   : > { %1835 = vst [vmem:[%s3375_s28 + $0xf8] sm:$0xff] %v1771_v45 }
 0x322   : > { %v2386_v60 = vpop.eup %2385 }
 0x323   : > { %v1803_v62 = vmul.f32 %v2386_v60, %v3672_v40 }
 0x324   : > { %v2388_v13 = vpop.eup %2387 }
 0x325   : > { %1867 = vst [vmem:[%s3375_s28 + $0x1f8] sm:$0xff] %v1803_v62  ;;  %v1801_v39 = vmul.f32 %v2388_v13, %v3678_v6 }
 0x327   : > { %1865 = vst [vmem:[%s3375_s28 + $0x1e8] sm:$0xff] %v1801_v39 }
 0x328   : > { %2537 = shalt.err (!%p2534_p11)
}
 0x329   : > { %s2594_s27 = smov 128   ;;  %s2595_s12 = smov 8  }
 0x32a   : > { %2068 = dma.vmem_to_hbm [thread:$0]  (%p2698_p3), %s1882_s30, 8192, %s1884_s8, %s1869_s22, %s2594_s27, %s2594_s27, %s2595_s12  }
 0x32b PF: > { %s1898_s24 = sand.u32 1, %s2576_s18   ;;  %p3845_p12 = scmp.ge.s32.totalorder %s2588_s21, 2 }
 0x32c   : > { %s1899_s13 = scalar_lea.sflag [#allocation4], %s1898_s24 }
 0x32d   : > { %p2085_p13 = pnand %p3845_p12, %p2661_p6 }
 0x32f   : > { %p2086_p0 = pneg %p2085_p13 }
 0x331   : > { %2571 = dma.done.wait (%p2086_p0), %s1899_s13, 8192  }
 0x332   : > { %2573 = vsyncadd (%p2086_p0), %s1899_s13, 4294959104  ;;  %s3846_s10 = sld [smem:[#allocation16_spill]]  ;;  %p22_p5 = scmp.ge.s32.totalorder %s2688_s14, 4  }
 0x333   : > { %s3847_s18 = smov %s2580_s19  ;;  %s3848_s19 = smov %s2584_s20 }
 0x334   : > { %s3850_s21 = smov %s2688_s14  ;;  %24 = sbr.rel (!%p22_p5) target bundleno = 12 (0xc), region = 106 }
 0x338   : > { %s3849_s20 = smov %s3846_s10 }
 0x339   :  { %1905 = vsyncpa [#allocation3], 1 }
 0x33a   :  { %1907 = vsyncpa [#allocation3 + $0x1], 1 }
 0x33b   :  { %1908 = vsyncpa [#allocation6], 1 }
 0x33c   :  { %1910 = vsyncpa [#allocation6 + $0x1], 1 }
 0x33d   :  { %1911 = vsyncpa [#allocation9], 1 }
 0x33e   :  { %1912 = vsyncpa [#allocation4], 1 }
 0x33f   :  { %1914 = vsyncpa [#allocation4 + $0x1], 1 }

</bundles_post_ra>
